<compile_context>
chip_gen: v7x
topology: tpu7x:2x2x1
jax: 0.10.0
libtpu: 0.0.40
codegen_flags: <defaults>
</compile_context>

<pallas_src>
import jax
import jax.numpy as jnp
from jax.experimental import pallas as pl
from jax.experimental.pallas import tpu as pltpu

# ----- hyperparameters implied by the module (opt.*) -----
LATENT_DIM = 32
CHANNELS = 1
IMG_SIZE = 16
IMG_PROD = CHANNELS * IMG_SIZE * IMG_SIZE  # 256
BN_EPS = 1e-5

# ----- packed layout for the small per-feature vectors (f32) -----
# Every size is a multiple of 128, so all slice offsets are lane-aligned.
_VEC_SIZES = {
    "b1": 128, "b5": IMG_PROD,
    "g2": 256, "be2": 256,
    "g3": 512, "be3": 512,
    "g4": 1024, "be4": 1024,
}
_VEC_ORDER = ("b1", "b5", "g2", "be2", "g3", "be3", "g4", "be4")
_VEC_OFFSETS = {}
_off = 0
for _name in _VEC_ORDER:
    _VEC_OFFSETS[_name] = _off
    _off += _VEC_SIZES[_name]
VEC_TOTAL = _off  # 3968 = 31 * 128

# ----- packed layout for the small weights w1..w3 (bf16, 512 lanes) -----
# Row offsets are multiples of 16 (bf16 sublane tile) and column slices are
# multiples of 128 (lane tile), so the in-kernel slices are aligned views.
_W1_R = (0, 32)        # (32, 128) stored in cols [0:128]
_W2_R = (32, 160)      # (128, 256) stored in cols [0:256]
_W3_R = (160, 416)     # (256, 512) stored in cols [0:512]
_W123_ROWS = 416


def _vec(vec_ref_or_arr, name):
    off = _VEC_OFFSETS[name]
    return vec_ref_or_arr[:, off:off + _VEC_SIZES[name]]


def _w123_parts(w):
    """Static, tile-aligned slices of the packed w1..w3 blob (ref or array)."""
    w1 = w[_W1_R[0]:_W1_R[1], 0:128]
    w2 = w[_W2_R[0]:_W2_R[1], 0:256]
    w3 = w[_W3_R[0]:_W3_R[1], 0:512]
    return w1, w2, w3


def _bn_train(y, gamma, beta):
    """PyTorch BatchNorm1d training-mode forward, folded to one multiply-add.

    y: (B, N) f32.  One reduction pass (E[y], E[y^2]); per-feature scale/shift
    are computed on (1, N) rows; the wide (B, N) path is y*scale + shift.
    """
    mu = jnp.mean(y, axis=0, keepdims=True)
    ms = jnp.mean(y * y, axis=0, keepdims=True)
    var = ms - mu * mu                                    # biased variance
    scale = gamma * jax.lax.rsqrt(var + BN_EPS)           # (1, N) row math
    shift = beta - mu * scale
    return y * scale + shift


def generator_kernel(z_ref, w123_ref, vec_ref, w4_hbm, w5_hbm, out_ref,
                     w4_vmem, w5_vmem, sem):
    # Kick off the big-weight DMAs immediately; they overlap layers 1-3.
    cp4 = pltpu.make_async_copy(w4_hbm, w4_vmem, sem.at[0])
    cp5 = pltpu.make_async_copy(w5_hbm, w5_vmem, sem.at[1])
    cp4.start()
    cp5.start()

    def mm(x_f32, w_bf16):
        # bf16 x bf16 on the MXU, f32 accumulation.
        return jnp.dot(x_f32.astype(jnp.bfloat16), w_bf16,
                       preferred_element_type=jnp.float32)

    w1, w2, w3 = _w123_parts(w123_ref)

    # Linear(latent, 128) + ReLU
    h = mm(z_ref[...], w1) + _vec(vec_ref, "b1")
    h = jnp.maximum(h, 0.0)

    # Linear(128, 256) [bias cancelled by BN] + BatchNorm1d(256) + ReLU
    h = mm(h, w2)
    h = jnp.maximum(_bn_train(h, _vec(vec_ref, "g2"), _vec(vec_ref, "be2")), 0.0)

    # Linear(256, 512) + BatchNorm1d(512) + ReLU
    h = mm(h, w3)
    h = jnp.maximum(_bn_train(h, _vec(vec_ref, "g3"), _vec(vec_ref, "be3")), 0.0)

    # Linear(512, 1024) + BatchNorm1d(1024) + ReLU   (wait only for w4 here)
    cp4.wait()
    h = mm(h, w4_vmem[...])
    h = jnp.maximum(_bn_train(h, _vec(vec_ref, "g4"), _vec(vec_ref, "be4")), 0.0)

    # Linear(1024, C*H*W) + Tanh                      (wait only for w5 here)
    cp5.wait()
    h = mm(h, w5_vmem[...]) + _vec(vec_ref, "b5")
    out_ref[...] = jnp.tanh(h)


@jax.jit
def generator_forward(z, params):
    """z: (B, LATENT_DIM) f32 -> img: (B, CHANNELS, IMG_SIZE, IMG_SIZE) f32."""
    B = z.shape[0]
    if B < 2:
        raise ValueError("training-mode BatchNorm1d requires batch size >= 2")

    # Advisory cost hint so XLA can overlap neighbouring HLOs.
    flops = 2 * B * (LATENT_DIM * 128 + 128 * 256 + 256 * 512
                     + 512 * 1024 + 1024 * IMG_PROD)
    bytes_weights = 2 * (_W123_ROWS * 512 + 512 * 1024 + 1024 * IMG_PROD)
    bytes_io = 4 * (B * LATENT_DIM + B * IMG_PROD + VEC_TOTAL)
    cost = pl.CostEstimate(flops=flops,
                           transcendentals=B * IMG_PROD,
                           bytes_accessed=bytes_weights + bytes_io)

    vmem = pl.BlockSpec(memory_space=pltpu.MemorySpace.VMEM)
    hbm = pl.BlockSpec(memory_space=pl.ANY)

    out_flat = pl.pallas_call(
        generator_kernel,
        out_shape=jax.ShapeDtypeStruct((B, IMG_PROD), jnp.float32),
        in_specs=[vmem, vmem, vmem, hbm, hbm],
        out_specs=vmem,
        scratch_shapes=[
            pltpu.VMEM((512, 1024), jnp.bfloat16),      # w4 landing buffer
            pltpu.VMEM((1024, IMG_PROD), jnp.bfloat16),  # w5 landing buffer
            pltpu.SemaphoreType.DMA((2,)),
        ],
        compiler_params=pltpu.CompilerParams(vmem_limit_bytes=16 << 20),
        cost_estimate=cost,
    )(z, params["w123"], params["vec"], params["w4"], params["w5"])

    # glue: PyTorch img.view(B, C, H, W)
    return out_flat.reshape(B, CHANNELS, IMG_SIZE, IMG_SIZE)


def init_params(key):
    """Deterministic synthetic parameters (shapes match the nn.Sequential).

    Weights are bf16 (MXU-native; ~1e-2-level deviation from an f32 PyTorch
    model is expected and matched by the in-script reference).  Biases
    b2/b3/b4 are omitted: they precede training-mode BatchNorm which cancels
    them (training-mode forward only).
    """
    dims = [LATENT_DIM, 128, 256, 512, 1024, IMG_PROD]
    keys = jax.random.split(key, 2 * (len(dims) - 1))
    ws = []
    vec_parts = {}
    for i in range(len(dims) - 1):
        fan_in, fan_out = dims[i], dims[i + 1]
        scale = 1.0 / jnp.sqrt(jnp.float32(fan_in))
        w = jax.random.uniform(keys[2 * i], (fan_in, fan_out), jnp.float32,
                               -1.0, 1.0) * scale
        ws.append(w.astype(jnp.bfloat16))
        if i + 1 in (1, 5):  # only layer-1 and layer-5 biases survive BN
            b = jax.random.uniform(keys[2 * i + 1], (1, fan_out), jnp.float32,
                                   -1.0, 1.0) * scale
            vec_parts[f"b{i+1}"] = b
    # BatchNorm affine params (PyTorch default init: gamma=1, beta=0)
    for idx, dim in zip((2, 3, 4), (256, 512, 1024)):
        vec_parts[f"g{idx}"] = jnp.ones((1, dim), jnp.float32)
        vec_parts[f"be{idx}"] = jnp.zeros((1, dim), jnp.float32)

    # Pack w1..w3 into one contiguous bf16 blob (single prologue DMA).
    w123 = jnp.zeros((_W123_ROWS, 512), jnp.bfloat16)
    w123 = w123.at[_W1_R[0]:_W1_R[1], 0:128].set(ws[0])
    w123 = w123.at[_W2_R[0]:_W2_R[1], 0:256].set(ws[1])
    w123 = w123.at[_W3_R[0]:_W3_R[1], 0:512].set(ws[2])

    params = {
        "w123": w123,
        "w4": ws[3],
        "w5": ws[4],
        "vec": jnp.concatenate([vec_parts[n] for n in _VEC_ORDER], axis=1),
    }
    assert params["vec"].shape == (1, VEC_TOTAL)
    return params


def reference_forward(z, params):
    """Pure-JAX reference with identical bf16-weight / f32-accum semantics."""
    def mm(x, w):
        return jnp.dot(x.astype(jnp.bfloat16), w,
                       preferred_element_type=jnp.float32)

    vec = params["vec"]
    w1, w2, w3 = _w123_parts(params["w123"])
    h = jnp.maximum(mm(z, w1) + _vec(vec, "b1"), 0.0)
    h = jnp.maximum(_bn_train(mm(h, w2), _vec(vec, "g2"), _vec(vec, "be2")), 0.0)
    h = jnp.maximum(_bn_train(mm(h, w3), _vec(vec, "g3"), _vec(vec, "be3")), 0.0)
    h = jnp.maximum(_bn_train(mm(h, params["w4"]),
                              _vec(vec, "g4"), _vec(vec, "be4")), 0.0)
    h = jnp.tanh(mm(h, params["w5"]) + _vec(vec, "b5"))
    return h.reshape(z.shape[0], CHANNELS, IMG_SIZE, IMG_SIZE)


if __name__ == "__main__":
    key = jax.random.PRNGKey(0)
    kp, kz = jax.random.split(key)
    params = init_params(kp)

    B = 8  # BatchNorm with batch statistics requires B >= 2 (enforced)
    z = jax.random.normal(kz, (B, LATENT_DIM), jnp.float32)

    img = generator_forward(z, params)
    jax.block_until_ready(img)

    ref = reference_forward(z, params)
    assert img.shape == (B, CHANNELS, IMG_SIZE, IMG_SIZE), img.shape
    assert jnp.allclose(img, ref, atol=2e-2, rtol=2e-2), "mismatch vs reference"

    print("KERNEL_OK")
</pallas_src>

<mosaic_0001>
module attributes {stable_mosaic.version = 11 : i64} {
  func.func @generator_kernel(%arg0: memref<8x32xf32, #tpu.memory_space<vmem>>, %arg1: memref<416x512xbf16, #tpu.memory_space<vmem>>, %arg2: memref<1x3968xf32, #tpu.memory_space<vmem>>, %arg3: memref<512x1024xbf16, #tpu.memory_space<any>>, %arg4: memref<1024x256xbf16, #tpu.memory_space<any>>, %arg5: memref<8x256xf32, #tpu.memory_space<vmem>>, %arg6: memref<512x1024xbf16, #tpu.memory_space<vmem>>, %arg7: memref<1024x256xbf16, #tpu.memory_space<vmem>>, %arg8: memref<2x!tpu.dma_semaphore, #tpu.memory_space<semaphore_mem>>) attributes {dimension_semantics = [], scalar_prefetch = 0 : i64, scratch_operands = 3 : i64, tpu.core_type = #tpu.core_type<tc>} {
    %c0_i32 = arith.constant 0 : i32
    %0 = tpu.memref_slice %arg8[%c0_i32] : memref<2x!tpu.dma_semaphore, #tpu.memory_space<semaphore_mem>> -> memref<1x!tpu.dma_semaphore, #tpu.memory_space<semaphore_mem>>
    %1 = tpu.memref_squeeze %0 : memref<1x!tpu.dma_semaphore, #tpu.memory_space<semaphore_mem>> -> memref<!tpu.dma_semaphore, #tpu.memory_space<semaphore_mem>>
    tpu.enqueue_dma source(%arg3 : memref<512x1024xbf16, #tpu.memory_space<any>>) target(%arg6 : memref<512x1024xbf16, #tpu.memory_space<vmem>>) target_semaphore(%1 : memref<!tpu.dma_semaphore, #tpu.memory_space<semaphore_mem>>)
    %c1_i32 = arith.constant 1 : i32
    %2 = tpu.memref_slice %arg8[%c1_i32] : memref<2x!tpu.dma_semaphore, #tpu.memory_space<semaphore_mem>> -> memref<1x!tpu.dma_semaphore, #tpu.memory_space<semaphore_mem>>
    %3 = tpu.memref_squeeze %2 : memref<1x!tpu.dma_semaphore, #tpu.memory_space<semaphore_mem>> -> memref<!tpu.dma_semaphore, #tpu.memory_space<semaphore_mem>>
    tpu.enqueue_dma source(%arg4 : memref<1024x256xbf16, #tpu.memory_space<any>>) target(%arg7 : memref<1024x256xbf16, #tpu.memory_space<vmem>>) target_semaphore(%3 : memref<!tpu.dma_semaphore, #tpu.memory_space<semaphore_mem>>)
    %c0 = arith.constant 0 : index
    %c0_0 = arith.constant 0 : index
    %4 = vector.load %arg1[%c0, %c0_0] : memref<416x512xbf16, #tpu.memory_space<vmem>>, vector<32x128xbf16>
    %c32 = arith.constant 32 : index
    %c0_1 = arith.constant 0 : index
    %5 = vector.load %arg1[%c32, %c0_1] : memref<416x512xbf16, #tpu.memory_space<vmem>>, vector<128x256xbf16>
    %c160 = arith.constant 160 : index
    %c0_2 = arith.constant 0 : index
    %6 = vector.load %arg1[%c160, %c0_2] : memref<416x512xbf16, #tpu.memory_space<vmem>>, vector<256x512xbf16>
    %c0_3 = arith.constant 0 : index
    %c0_4 = arith.constant 0 : index
    %7 = vector.load %arg0[%c0_3, %c0_4] : memref<8x32xf32, #tpu.memory_space<vmem>>, vector<8x32xf32>
    %8 = arith.truncf %7 : vector<8x32xf32> to vector<8x32xbf16>
    %cst = arith.constant dense<0.000000e+00> : vector<8x128xf32>
    %9 = tpu.matmul %8, %4, %cst {dimension_numbers = #tpu.dot_dimension_numbers<[1], [0], [0], [1], [0, 0, 1, 1], [], []>} : vector<8x32xbf16>, vector<32x128xbf16>, vector<8x128xf32> -> vector<8x128xf32>
    %c0_5 = arith.constant 0 : index
    %c0_6 = arith.constant 0 : index
    %10 = vector.load %arg2[%c0_5, %c0_6] : memref<1x3968xf32, #tpu.memory_space<vmem>>, vector<1x128xf32>
    %11 = vector.broadcast %10 : vector<1x128xf32> to vector<8x128xf32>
    %12 = arith.addf %9, %11 : vector<8x128xf32>
    %cst_7 = arith.constant 0.000000e+00 : f32
    %13 = vector.broadcast %cst_7 : f32 to vector<8x128xf32>
    %14 = arith.maximumf %12, %13 : vector<8x128xf32>
    %15 = arith.truncf %14 : vector<8x128xf32> to vector<8x128xbf16>
    %cst_8 = arith.constant dense<0.000000e+00> : vector<8x256xf32>
    %16 = tpu.matmul %15, %5, %cst_8 {dimension_numbers = #tpu.dot_dimension_numbers<[1], [0], [0], [1], [0, 0, 1, 1], [], []>} : vector<8x128xbf16>, vector<128x256xbf16>, vector<8x256xf32> -> vector<8x256xf32>
    %c0_9 = arith.constant 0 : index
    %c384 = arith.constant 384 : index
    %17 = vector.load %arg2[%c0_9, %c384] : memref<1x3968xf32, #tpu.memory_space<vmem>>, vector<1x256xf32>
    %c0_10 = arith.constant 0 : index
    %c640 = arith.constant 640 : index
    %18 = vector.load %arg2[%c0_10, %c640] : memref<1x3968xf32, #tpu.memory_space<vmem>>, vector<1x256xf32>
    %cst_11 = arith.constant dense<0.000000e+00> : vector<256xf32>
    %19 = vector.multi_reduction <add>, %16, %cst_11 [0] : vector<8x256xf32> to vector<256xf32>
    %20 = vector.shape_cast %19 : vector<256xf32> to vector<1x256xf32>
    %cst_12 = arith.constant 8.000000e+00 : f32
    %21 = vector.broadcast %cst_12 : f32 to vector<1x256xf32>
    %22 = arith.divf %20, %21 : vector<1x256xf32>
    %23 = arith.mulf %16, %16 : vector<8x256xf32>
    %cst_13 = arith.constant dense<0.000000e+00> : vector<256xf32>
    %24 = vector.multi_reduction <add>, %23, %cst_13 [0] : vector<8x256xf32> to vector<256xf32>
    %25 = vector.shape_cast %24 : vector<256xf32> to vector<1x256xf32>
    %cst_14 = arith.constant 8.000000e+00 : f32
    %26 = vector.broadcast %cst_14 : f32 to vector<1x256xf32>
    %27 = arith.divf %25, %26 : vector<1x256xf32>
    %28 = arith.mulf %22, %22 : vector<1x256xf32>
    %29 = arith.subf %27, %28 : vector<1x256xf32>
    %cst_15 = arith.constant 9.99999974E-6 : f32
    %30 = vector.broadcast %cst_15 : f32 to vector<1x256xf32>
    %31 = arith.addf %29, %30 : vector<1x256xf32>
    %32 = math.rsqrt %31 : vector<1x256xf32>
    %33 = arith.mulf %17, %32 : vector<1x256xf32>
    %34 = arith.mulf %22, %33 : vector<1x256xf32>
    %35 = arith.subf %18, %34 : vector<1x256xf32>
    %36 = vector.broadcast %33 : vector<1x256xf32> to vector<8x256xf32>
    %37 = arith.mulf %16, %36 : vector<8x256xf32>
    %38 = vector.broadcast %35 : vector<1x256xf32> to vector<8x256xf32>
    %39 = arith.addf %37, %38 : vector<8x256xf32>
    %cst_16 = arith.constant 0.000000e+00 : f32
    %40 = vector.broadcast %cst_16 : f32 to vector<8x256xf32>
    %41 = arith.maximumf %39, %40 : vector<8x256xf32>
    %42 = arith.truncf %41 : vector<8x256xf32> to vector<8x256xbf16>
    %cst_17 = arith.constant dense<0.000000e+00> : vector<8x512xf32>
    %43 = tpu.matmul %42, %6, %cst_17 {dimension_numbers = #tpu.dot_dimension_numbers<[1], [0], [0], [1], [0, 0, 1, 1], [], []>} : vector<8x256xbf16>, vector<256x512xbf16>, vector<8x512xf32> -> vector<8x512xf32>
    %c0_18 = arith.constant 0 : index
    %c896 = arith.constant 896 : index
    %44 = vector.load %arg2[%c0_18, %c896] : memref<1x3968xf32, #tpu.memory_space<vmem>>, vector<1x512xf32>
    %c0_19 = arith.constant 0 : index
    %c1408 = arith.constant 1408 : index
    %45 = vector.load %arg2[%c0_19, %c1408] : memref<1x3968xf32, #tpu.memory_space<vmem>>, vector<1x512xf32>
    %cst_20 = arith.constant dense<0.000000e+00> : vector<512xf32>
    %46 = vector.multi_reduction <add>, %43, %cst_20 [0] : vector<8x512xf32> to vector<512xf32>
    %47 = vector.shape_cast %46 : vector<512xf32> to vector<1x512xf32>
    %cst_21 = arith.constant 8.000000e+00 : f32
    %48 = vector.broadcast %cst_21 : f32 to vector<1x512xf32>
    %49 = arith.divf %47, %48 : vector<1x512xf32>
    %50 = arith.mulf %43, %43 : vector<8x512xf32>
    %cst_22 = arith.constant dense<0.000000e+00> : vector<512xf32>
    %51 = vector.multi_reduction <add>, %50, %cst_22 [0] : vector<8x512xf32> to vector<512xf32>
    %52 = vector.shape_cast %51 : vector<512xf32> to vector<1x512xf32>
    %cst_23 = arith.constant 8.000000e+00 : f32
    %53 = vector.broadcast %cst_23 : f32 to vector<1x512xf32>
    %54 = arith.divf %52, %53 : vector<1x512xf32>
    %55 = arith.mulf %49, %49 : vector<1x512xf32>
    %56 = arith.subf %54, %55 : vector<1x512xf32>
    %cst_24 = arith.constant 9.99999974E-6 : f32
    %57 = vector.broadcast %cst_24 : f32 to vector<1x512xf32>
    %58 = arith.addf %56, %57 : vector<1x512xf32>
    %59 = math.rsqrt %58 : vector<1x512xf32>
    %60 = arith.mulf %44, %59 : vector<1x512xf32>
    %61 = arith.mulf %49, %60 : vector<1x512xf32>
    %62 = arith.subf %45, %61 : vector<1x512xf32>
    %63 = vector.broadcast %60 : vector<1x512xf32> to vector<8x512xf32>
    %64 = arith.mulf %43, %63 : vector<8x512xf32>
    %65 = vector.broadcast %62 : vector<1x512xf32> to vector<8x512xf32>
    %66 = arith.addf %64, %65 : vector<8x512xf32>
    %cst_25 = arith.constant 0.000000e+00 : f32
    %67 = vector.broadcast %cst_25 : f32 to vector<8x512xf32>
    %68 = arith.maximumf %66, %67 : vector<8x512xf32>
    %c0_i32_26 = arith.constant 0 : i32
    %69 = tpu.memref_slice %arg8[%c0_i32_26] : memref<2x!tpu.dma_semaphore, #tpu.memory_space<semaphore_mem>> -> memref<1x!tpu.dma_semaphore, #tpu.memory_space<semaphore_mem>>
    %70 = tpu.memref_squeeze %69 : memref<1x!tpu.dma_semaphore, #tpu.memory_space<semaphore_mem>> -> memref<!tpu.dma_semaphore, #tpu.memory_space<semaphore_mem>>
    tpu.wait_dma2 semaphore(%70 : memref<!tpu.dma_semaphore, #tpu.memory_space<semaphore_mem>>) src(%arg3 : memref<512x1024xbf16, #tpu.memory_space<any>>) dst(%arg6 : memref<512x1024xbf16, #tpu.memory_space<vmem>>)
    %c0_27 = arith.constant 0 : index
    %c0_28 = arith.constant 0 : index
    %71 = vector.load %arg6[%c0_27, %c0_28] : memref<512x1024xbf16, #tpu.memory_space<vmem>>, vector<512x1024xbf16>
    %72 = arith.truncf %68 : vector<8x512xf32> to vector<8x512xbf16>
    %cst_29 = arith.constant dense<0.000000e+00> : vector<8x1024xf32>
    %73 = tpu.matmul %72, %71, %cst_29 {dimension_numbers = #tpu.dot_dimension_numbers<[1], [0], [0], [1], [0, 0, 1, 1], [], []>} : vector<8x512xbf16>, vector<512x1024xbf16>, vector<8x1024xf32> -> vector<8x1024xf32>
    %c0_30 = arith.constant 0 : index
    %c1920 = arith.constant 1920 : index
    %74 = vector.load %arg2[%c0_30, %c1920] : memref<1x3968xf32, #tpu.memory_space<vmem>>, vector<1x1024xf32>
    %c0_31 = arith.constant 0 : index
    %c2944 = arith.constant 2944 : index
    %75 = vector.load %arg2[%c0_31, %c2944] : memref<1x3968xf32, #tpu.memory_space<vmem>>, vector<1x1024xf32>
    %cst_32 = arith.constant dense<0.000000e+00> : vector<1024xf32>
    %76 = vector.multi_reduction <add>, %73, %cst_32 [0] : vector<8x1024xf32> to vector<1024xf32>
    %77 = vector.shape_cast %76 : vector<1024xf32> to vector<1x1024xf32>
    %cst_33 = arith.constant 8.000000e+00 : f32
    %78 = vector.broadcast %cst_33 : f32 to vector<1x1024xf32>
    %79 = arith.divf %77, %78 : vector<1x1024xf32>
    %80 = arith.mulf %73, %73 : vector<8x1024xf32>
    %cst_34 = arith.constant dense<0.000000e+00> : vector<1024xf32>
    %81 = vector.multi_reduction <add>, %80, %cst_34 [0] : vector<8x1024xf32> to vector<1024xf32>
    %82 = vector.shape_cast %81 : vector<1024xf32> to vector<1x1024xf32>
    %cst_35 = arith.constant 8.000000e+00 : f32
    %83 = vector.broadcast %cst_35 : f32 to vector<1x1024xf32>
    %84 = arith.divf %82, %83 : vector<1x1024xf32>
    %85 = arith.mulf %79, %79 : vector<1x1024xf32>
    %86 = arith.subf %84, %85 : vector<1x1024xf32>
    %cst_36 = arith.constant 9.99999974E-6 : f32
    %87 = vector.broadcast %cst_36 : f32 to vector<1x1024xf32>
    %88 = arith.addf %86, %87 : vector<1x1024xf32>
    %89 = math.rsqrt %88 : vector<1x1024xf32>
    %90 = arith.mulf %74, %89 : vector<1x1024xf32>
    %91 = arith.mulf %79, %90 : vector<1x1024xf32>
    %92 = arith.subf %75, %91 : vector<1x1024xf32>
    %93 = vector.broadcast %90 : vector<1x1024xf32> to vector<8x1024xf32>
    %94 = arith.mulf %73, %93 : vector<8x1024xf32>
    %95 = vector.broadcast %92 : vector<1x1024xf32> to vector<8x1024xf32>
    %96 = arith.addf %94, %95 : vector<8x1024xf32>
    %cst_37 = arith.constant 0.000000e+00 : f32
    %97 = vector.broadcast %cst_37 : f32 to vector<8x1024xf32>
    %98 = arith.maximumf %96, %97 : vector<8x1024xf32>
    %c1_i32_38 = arith.constant 1 : i32
    %99 = tpu.memref_slice %arg8[%c1_i32_38] : memref<2x!tpu.dma_semaphore, #tpu.memory_space<semaphore_mem>> -> memref<1x!tpu.dma_semaphore, #tpu.memory_space<semaphore_mem>>
    %100 = tpu.memref_squeeze %99 : memref<1x!tpu.dma_semaphore, #tpu.memory_space<semaphore_mem>> -> memref<!tpu.dma_semaphore, #tpu.memory_space<semaphore_mem>>
    tpu.wait_dma2 semaphore(%100 : memref<!tpu.dma_semaphore, #tpu.memory_space<semaphore_mem>>) src(%arg4 : memref<1024x256xbf16, #tpu.memory_space<any>>) dst(%arg7 : memref<1024x256xbf16, #tpu.memory_space<vmem>>)
    %c0_39 = arith.constant 0 : index
    %c0_40 = arith.constant 0 : index
    %101 = vector.load %arg7[%c0_39, %c0_40] : memref<1024x256xbf16, #tpu.memory_space<vmem>>, vector<1024x256xbf16>
    %102 = arith.truncf %98 : vector<8x1024xf32> to vector<8x1024xbf16>
    %cst_41 = arith.constant dense<0.000000e+00> : vector<8x256xf32>
    %103 = tpu.matmul %102, %101, %cst_41 {dimension_numbers = #tpu.dot_dimension_numbers<[1], [0], [0], [1], [0, 0, 1, 1], [], []>} : vector<8x1024xbf16>, vector<1024x256xbf16>, vector<8x256xf32> -> vector<8x256xf32>
    %c0_42 = arith.constant 0 : index
    %c128 = arith.constant 128 : index
    %104 = vector.load %arg2[%c0_42, %c128] : memref<1x3968xf32, #tpu.memory_space<vmem>>, vector<1x256xf32>
    %105 = vector.broadcast %104 : vector<1x256xf32> to vector<8x256xf32>
    %106 = arith.addf %103, %105 : vector<8x256xf32>
    %107 = math.tanh %106 : vector<8x256xf32>
    %c0_43 = arith.constant 0 : index
    %c0_44 = arith.constant 0 : index
    %108 = vector.load %arg5[%c0_43, %c0_44] : memref<8x256xf32, #tpu.memory_space<vmem>>, vector<8x256xf32>
    tpu.vector_store %arg5[%c0_43, %c0_44], %107 {strides = array<i32>} : memref<8x256xf32, #tpu.memory_space<vmem>>, vector<8x256xf32>,
    return
  }
}

</mosaic_0001>

<bundles_post_ra>
// kernel: generator_forward.1
= control target key start
LH: loop header
LB: loop body
LE: loop exit
PB: predicated region body
PF: predicated region fallthrough
CT: control target
= control target key end

     0   :  { %10 = vsyncpa [#allocation6], 0  ;;  %s3178_s0 = inlined_call_operand.hbm [shape: f32[8,32], index: 0, kind: input, shape index: {}]   ;;  %s3179_s1 = inlined_call_operand.hbm [shape: bf16[416,512], index: 1, kind: input, shape index: {}]   ;;  %s3180_s2 = inlined_call_operand.hbm [shape: f32[1,3968], index: 2, kind: input, shape index: {}]   ;;  %s3181_s3 = inlined_call_operand.hbm [shape: bf16[512,1024], index: 3, kind: input, shape index: {}]   ;;  %s3182_s4 = inlined_call_operand.hbm [shape: bf16[1024,256], index: 4, kind: input, shape index: {}]   ;;  %s3183_s5 = inlined_call_operand.vmem [shape: f32[8,256], index: 5, kind: output, shape index: {}]  }
   0x1   :  { %11 = vsyncpa [#allocation8], 0  ;;  %s2801_s18 = smov [#allocation7]   ;;  %s2727_s22 = scalar_lea.hbm %s3179_s1, 13312 }
   0x2   :  { %s27_s19 = sshll.u32 %s2801_s18, 4  ;;  %p2728_p0 = scmp.ne.s32.totalorder %s3179_s1, %s2727_s22  ;;  %s28_s19 = int_to_ptr.vmem [resolvable:$true] %s27_s19 }
   0x3   :  { %p2731_p1 = scmp.lt.u32.totalorder %s2727_s22, %s3179_s1 }
   0x5   :  { %p2733_p2 = pnand %p2731_p1, %p2728_p0 }
   0x7   :  { %2736 = shalt.err (!%p2733_p2)
}
   0x8   :  { %s2737_s27 = scalar_lea.vmem %s28_s19, 13312  ;;  %p2742_p4 = scmp.lt.s32.totalorder %s28_s19, %s28_s19 }
   0x9   :  { %p2738_p3 = scmp.ne.s32.totalorder %s28_s19, %s2737_s27  ;;  %p2743_p5 = scmp.lt.s32.totalorder %s2737_s27, %s2737_s27 }
   0xb   :  { %p2744_p6 = por %p2743_p5, %p2742_p4 }
   0xd   :  { %p2745_p7 = pnand %p2744_p6, %p2738_p3 }
   0xf   :  { %2748 = shalt.err (!%p2745_p7)
}
  0x10   :  { %s2802_s28 = smov 256   ;;  %s2803_s29 = smov 16  }
  0x11   :  { %33 = dma.hbm_to_vmem [thread:$0]  %s3179_s1, 13312, %s28_s19, [#allocation8], %s2802_s28, %s2802_s28, %s2803_s29  }
  0x12   :  { %s2804_s7 = smov [#allocation5]   ;;  %s2805_s9 = smov [#allocation9]  }
  0x13   :  { %s18_s8 = sshll.u32 %s2804_s7, 4  ;;  %s40_s10 = sshll.u32 %s2805_s9, 4  ;;  %s19_s8 = int_to_ptr.vmem [resolvable:$true] %s18_s8  ;;  %s41_s10 = int_to_ptr.vmem [resolvable:$true] %s40_s10 }
  0x14   :  { %s2749_s13 = scalar_lea.hbm %s3178_s0, 128 }
  0x15   :  { %p2750_p8 = scmp.ne.s32.totalorder %s3178_s0, %s2749_s13  ;;  %p2753_p9 = scmp.lt.u32.totalorder %s2749_s13, %s3178_s0 }
  0x17   :  { %p2755_p10 = pnand %p2753_p9, %p2750_p8 }
  0x19   :  { %2758 = shalt.err (!%p2755_p10)
}
  0x1a   :  { %s2759_s1 = scalar_lea.vmem %s19_s8, 128  ;;  %p2764_p12 = scmp.lt.s32.totalorder %s19_s8, %s19_s8 }
  0x1b   :  { %p2760_p11 = scmp.ne.s32.totalorder %s19_s8, %s2759_s1  ;;  %p2765_p13 = scmp.lt.s32.totalorder %s2759_s1, %s2759_s1 }
  0x1d   :  { %p2766_p0 = por %p2765_p13, %p2764_p12 }
  0x1f   :  { %p2767_p1 = pnand %p2766_p0, %p2760_p11 }
  0x21   :  { %2770 = shalt.err (!%p2767_p1)
}
  0x22   :  { %21 = dma.hbm_to_vmem [thread:$0]  %s3178_s0, 128, %s19_s8, [#allocation6]  }
  0x23   :  { %s2771_s22 = scalar_lea.hbm %s3180_s2, 496 }
  0x24   :  { %p2772_p2 = scmp.ne.s32.totalorder %s3180_s2, %s2771_s22  ;;  %p2775_p3 = scmp.lt.u32.totalorder %s2771_s22, %s3180_s2 }
  0x26   :  { %p2777_p4 = pnand %p2775_p3, %p2772_p2 }
  0x28   :  { %2780 = shalt.err (!%p2777_p4)
}
  0x29   :  { %s2781_s27 = scalar_lea.vmem %s41_s10, 496  ;;  %s2785_s29 = scalar_lea.vmem %s41_s10, 512 }
  0x2a   :  { %p2782_p5 = scmp.ne.s32.totalorder %s41_s10, %s2781_s27  ;;  %p2786_p6 = scmp.lt.s32.totalorder %s41_s10, %s41_s10 }
  0x2b   :  { %p2787_p7 = scmp.lt.s32.totalorder %s2785_s29, %s2781_s27 }
  0x2d   :  { %p2788_p8 = por %p2787_p7, %p2786_p6 }
  0x2f   :  { %p2789_p9 = pnand %p2788_p8, %p2782_p5 }
  0x31   :  { %2792 = shalt.err (!%p2789_p9)
}
  0x32   :  { %43 = dma.hbm_to_vmem [thread:$0]  %s3180_s2, 496, %s41_s10, [#allocation8]  }
  0x33   :  { %2793 = dma.done.wait [#allocation6], 128  }
  0x34   :  { %2794 = vsyncadd [#allocation6], 4294967168 }
  0x35   :  { %2795 = dma.done.wait [#allocation8], 13808  }
  0x36   :  { %2796 = vsyncadd [#allocation8], 4294953488  ;;  %s58_s6 = sld [smem:[#allocation0]]   ;;  %s2806_s7 = smov 1024   ;;  %v2807_v0 = vmov 0.0   ;;  %vm2808_vm0 = vmmov 0  }
  0x37   :  { %70 = sst [smem:[#allocation11]] %s2806_s7  ;;  %2515 = vmatprep.subr.bf16.mxu0 %v2807_v0  ;;  %2519 = vmatprep.mubr.msk.bf16.mxu0 %vm2808_vm0, %v2807_v0  ;;  %s2809_s8 = smov 8   ;;  %vm229_vm1 = vcmask 261120   ;;  %v2821_v21 = vmov 0  }
  0x38   :  { %72 = sst [smem:[#allocation11 + $0x1]] %s2806_s7  ;;  %s2810_s9 = smov 512   ;;  %387 = vmatprep.mubr.bf16.mxu1 %v2821_v21 }
  0x39   :  { %74 = sst [smem:[#allocation11 + $0x2]] %s2809_s8  ;;  %s2811_s11 = smov [#allocation2]  }
  0x3a   :  { %82 = sst [smem:[#allocation11 + $0x6]] %s2810_s9  ;;  %s66_s12 = sshll.u32 %s2811_s11, 4  ;;  %s67_s12 = int_to_ptr.vmem [resolvable:$true] %s66_s12 }
  0x3b   :  { %s2812_s2 = smov 64   ;;  %s2813_s13 = smov 128  }
  0x3c   :  { %76 = sst [smem:[#allocation11 + $0x3]] %s2812_s2  ;;  %s2422_s10 = sshll.u32 %s58_s6, 26 }
  0x3d   :  { %78 = sst [smem:[#allocation11 + $0x4]] %s2813_s13  ;;  %s2423_s14 = sadd.s32 134217728, %s2422_s10 }
  0x3e   :  { %s2814_s15 = smov 2   ;;  %84 = sst [smem:[#allocation11 + $0x7]] %s2812_s2 }
  0x3f   :  { %80 = sst [smem:[#allocation11 + $0x5]] %s2814_s15  ;;  %s2815_s16 = smov 4  }
  0x40   :  { %86 = sst [smem:[#allocation11 + $0x8]] %s2815_s16  ;;  %s2816_s17 = smov [#allocation4]  }
  0x41   :  { %s2817_s1 = smov [#allocation10]   ;;  %s2818_s20 = smov [#allocation3]  }
  0x42   :  { %88 = dma.general %s3181_s3, 32768, %s67_s12, %s2816_s17, %s2817_s1, [#allocation11], %s2423_s14, 0  }
  0x43   :  { %105 = sst [smem:[#allocation13]] %s2802_s28  ;;  %s101_s21 = sshll.u32 %s2818_s20, 4  ;;  %s102_s21 = int_to_ptr.vmem [resolvable:$true] %s101_s21 }
  0x44   :  { %107 = sst [smem:[#allocation13 + $0x1]] %s2802_s28  ;;  %s2819_s22 = smov [#allocation4 + $0x1]  }
  0x45   :  { %109 = sst [smem:[#allocation13 + $0x2]] %s2814_s15  ;;  %s2820_s23 = smov [#allocation12]  }
  0x46   :  { %111 = sst [smem:[#allocation13 + $0x3]] %s2812_s2 }
  0x47   :  { %113 = sst [smem:[#allocation13 + $0x4]] %s2813_s13 }
  0x48   :  { %115 = sst [smem:[#allocation13 + $0x5]] %s2814_s15 }
  0x49   :  { %117 = sst [smem:[#allocation13 + $0x6]] %s2813_s13 }
  0x4a   :  { %119 = sst [smem:[#allocation13 + $0x7]] %s2812_s2 }
  0x4b   :  { %121 = sst [smem:[#allocation13 + $0x8]] %s2815_s16 }
  0x4c   :  { %123 = dma.general %s3182_s4, 16384, %s102_s21, %s2819_s22, %s2820_s23, [#allocation13], %s2423_s14, 0  }
  0x4d   :  { %v2573_v1 = vld [vmem:[#allocation7] ss:$16 sps:$4 sm:$0xff]   ;;  %v208_v3 = vld [vmem:[#allocation5] sm:$0xff]  ;;  %v2575_v4 = vld [vmem:[#allocation7 + $0x44] ss:$16 sps:$4 sm:$0xff]  }
  0x4e   :  { %v2574_v2 = vld [vmem:[#allocation7 + $0x20] ss:$16 sps:$4 sm:$0xff]   ;;  %2516 = vmatpush3.bf16.msra.mxu0 %v2573_v1  ;;  %v2578_v6 = vld [vmem:[#allocation7 + $0x64] ss:$16 sps:$4 sm:$0xff]   ;;  %v209_v7 = vpack.c.bf16 %v208_v3, %v208_v3  ;;  %355 = vmatprep.subr.bf16.mxu1 %v2575_v4  ;;  %v2649_v62 = vld [vmem:[#allocation7 + $0x14c] ss:$16 sps:$4 sm:$0xff]  }
  0x4f   :  { %2517 = vmatprep.subr.bf16.mxu0 %v2807_v0  ;;  %v2577_v5 = vld [vmem:[#allocation7 + $0x40] ss:$16 sps:$4 sm:$0xff]   ;;  %v2581_v9 = vld [vmem:[#allocation7 + $0x84] ss:$16 sps:$4 sm:$0xff]  }
  0x50   :  { %356 = vmatpush1.bf16.msra.mxu1 %v2577_v5  ;;  %v2580_v8 = vld [vmem:[#allocation7 + $0x60] ss:$16 sps:$4 sm:$0xff]   ;;  %v2584_v11 = vld [vmem:[#allocation7 + $0xa4] ss:$16 sps:$4 sm:$0xff]  }
  0x51   :  { %357 = vmatprep.subr.bf16.mxu1 %v2578_v6  ;;  %v2583_v10 = vld [vmem:[#allocation7 + $0x80] ss:$16 sps:$4 sm:$0xff]   ;;  %v2587_v13 = vld [vmem:[#allocation7 + $0xc4] ss:$16 sps:$4 sm:$0xff]  }
  0x52   :  { %2518 = vmatpush3.bf16.msra.mxu0 %v2574_v2  ;;  %v2586_v12 = vld [vmem:[#allocation7 + $0xa0] ss:$16 sps:$4 sm:$0xff]   ;;  %v2590_v15 = vld [vmem:[#allocation7 + $0xe4] ss:$16 sps:$4 sm:$0xff]  }
  0x53   :  { %v2589_v14 = vld [vmem:[#allocation7 + $0xc0] ss:$16 sps:$4 sm:$0xff]   ;;  %v2593_v17 = vld [vmem:[#allocation7 + $0x104] ss:$16 sps:$4 sm:$0xff]  }
  0x54   :  { %358 = vmatpush1.bf16.msra.mxu1 %v2580_v8  ;;  %v2592_v16 = vld [vmem:[#allocation7 + $0xe0] ss:$16 sps:$4 sm:$0xff]   ;;  %v2596_v19 = vld [vmem:[#allocation7 + $0x124] ss:$16 sps:$4 sm:$0xff]  }
  0x55   :  { %2520 = vmatmul.mubr.msk.bf16.vlgmr.msra.gmra.mrb[0].mxu0 %vm229_vm1, %v209_v7  ;;  %359 = vmatprep.subr.bf16.mxu1 %v2581_v9  ;;  %v2595_v18 = vld [vmem:[#allocation7 + $0x100] ss:$16 sps:$4 sm:$0xff]   ;;  %v2601_v22 = vld [vmem:[#allocation7 + $0x144] ss:$16 sps:$4 sm:$0xff]  }
  0x56   :  { %v2598_v20 = vld [vmem:[#allocation7 + $0x120] ss:$16 sps:$4 sm:$0xff]   ;;  %v2604_v32 = vld [vmem:[#allocation7 + $0x164] ss:$16 sps:$4 sm:$0xff]  }
  0x57   :  { %v2426_v23 = vld [vmem:[#allocation9] ss:$0 sm:$0xff]  ;;  %v2607_v34 = vld [vmem:[#allocation7 + $0x184] ss:$16 sps:$4 sm:$0xff]  }
  0x58   :  { %360 = vmatpush1.bf16.msra.mxu1 %v2583_v10  ;;  %v2599_v30 = vld [vmem:[#allocation7 + $0x140] ss:$16 sps:$4 sm:$0xff]   ;;  %v2610_v36 = vld [vmem:[#allocation7 + $0x1a4] ss:$16 sps:$4 sm:$0xff]  }
  0x59   :  { %361 = vmatprep.subr.bf16.mxu1 %v2584_v11  ;;  %v2602_v33 = vld [vmem:[#allocation7 + $0x160] ss:$16 sps:$4 sm:$0xff]   ;;  %v2613_v38 = vld [vmem:[#allocation7 + $0x1c4] ss:$16 sps:$4 sm:$0xff]  }
  0x5a   :  { %v2605_v35 = vld [vmem:[#allocation7 + $0x180] ss:$16 sps:$4 sm:$0xff]   ;;  %v2616_v40 = vld [vmem:[#allocation7 + $0x1e4] ss:$16 sps:$4 sm:$0xff]  }
  0x5b   :  { %v2608_v37 = vld [vmem:[#allocation7 + $0x1a0] ss:$16 sps:$4 sm:$0xff]   ;;  %v2619_v42 = vld [vmem:[#allocation7 + $0x204] ss:$16 sps:$4 sm:$0xff]  }
  0x5c   :  { %362 = vmatpush1.bf16.msra.mxu1 %v2586_v12  ;;  %v2611_v39 = vld [vmem:[#allocation7 + $0x1c0] ss:$16 sps:$4 sm:$0xff]   ;;  %v2622_v44 = vld [vmem:[#allocation7 + $0x224] ss:$16 sps:$4 sm:$0xff]  }
  0x5d   :  { %363 = vmatprep.subr.bf16.mxu1 %v2587_v13  ;;  %v2614_v41 = vld [vmem:[#allocation7 + $0x1e0] ss:$16 sps:$4 sm:$0xff]   ;;  %v2625_v46 = vld [vmem:[#allocation7 + $0x244] ss:$16 sps:$4 sm:$0xff]  }
  0x5e   :  { %v2617_v43 = vld [vmem:[#allocation7 + $0x200] ss:$16 sps:$4 sm:$0xff]   ;;  %v2628_v48 = vld [vmem:[#allocation7 + $0x264] ss:$16 sps:$4 sm:$0xff]  }
  0x5f   :  { %v2620_v45 = vld [vmem:[#allocation7 + $0x220] ss:$16 sps:$4 sm:$0xff]   ;;  %v2631_v50 = vld [vmem:[#allocation7 + $0x284] ss:$16 sps:$4 sm:$0xff]  }
  0x60   :  { %364 = vmatpush1.bf16.msra.mxu1 %v2589_v14  ;;  %v2623_v47 = vld [vmem:[#allocation7 + $0x240] ss:$16 sps:$4 sm:$0xff]   ;;  %v2634_v52 = vld [vmem:[#allocation7 + $0x2a4] ss:$16 sps:$4 sm:$0xff]  }
  0x61   :  { %365 = vmatprep.subr.bf16.mxu1 %v2590_v15  ;;  %v2626_v49 = vld [vmem:[#allocation7 + $0x260] ss:$16 sps:$4 sm:$0xff]   ;;  %v2637_v54 = vld [vmem:[#allocation7 + $0x2c4] ss:$16 sps:$4 sm:$0xff]  }
  0x62   :  { %v2629_v51 = vld [vmem:[#allocation7 + $0x280] ss:$16 sps:$4 sm:$0xff]   ;;  %v2640_v56 = vld [vmem:[#allocation7 + $0x2e4] ss:$16 sps:$4 sm:$0xff]  }
  0x63   :  { %v2632_v53 = vld [vmem:[#allocation7 + $0x2a0] ss:$16 sps:$4 sm:$0xff]   ;;  %v2643_v58 = vld [vmem:[#allocation7 + $0x304] ss:$16 sps:$4 sm:$0xff]  }
  0x64   :  { %366 = vmatpush1.bf16.msra.mxu1 %v2592_v16  ;;  %v2635_v55 = vld [vmem:[#allocation7 + $0x2c0] ss:$16 sps:$4 sm:$0xff]   ;;  %v2646_v60 = vld [vmem:[#allocation7 + $0x324] ss:$16 sps:$4 sm:$0xff]  }
  0x65   :  { %367 = vmatprep.subr.bf16.mxu1 %v2593_v17  ;;  %v2638_v57 = vld [vmem:[#allocation7 + $0x2e0] ss:$16 sps:$4 sm:$0xff]  }
  0x66   :  { %v2641_v59 = vld [vmem:[#allocation7 + $0x300] ss:$16 sps:$4 sm:$0xff]  }
  0x67   :  { %v2644_v61 = vld [vmem:[#allocation7 + $0x320] ss:$16 sps:$4 sm:$0xff]  }
  0x68   :  { %368 = vmatpush1.bf16.msra.mxu1 %v2595_v18 }
  0x69   :  { %369 = vmatprep.subr.bf16.mxu1 %v2596_v19 }
  0x6c   :  { %370 = vmatpush1.bf16.msra.mxu1 %v2598_v20 }
  0x6d   :  { %827 = vmatprep.subr.bf16.mxu1 %v2601_v22 }
 0x128   :  { %v267_v24 = vpop.f32.mrb[0].mxu0 }
 0x129   :  { %v268_v25 = vadd.f32 %v2426_v23, %v267_v24  ;;  %v2521_v26 = vpop.f32.mrb[1].mxu0 }
 0x12a   :  { %v270_v27 = vpop.f32.mrb[2].mxu0 }
 0x12b   :  { %v273_v28 = vmax.f32 %v268_v25, 0.0  ;;  %v2522_v29 = vpop.f32.mrb[3].mxu0 }
 0x12d   :  { %v274_v31 = vpack.c.bf16 %v273_v28, %v273_v28 }
 0x12f   :  { %388 = vmatmul.mubr.bf16.vlgmr.msra.gmra.mrb[0].mxu1 %v274_v31 }
 0x130   :  { %828 = vmatpush1.bf16.msra.mxu1 %v2599_v30 }
 0x131   :  { %829 = vmatprep.subr.bf16.mxu1 %v2604_v32 }
 0x134   :  { %830 = vmatpush1.bf16.msra.mxu1 %v2602_v33 }
 0x135   :  { %831 = vmatprep.subr.bf16.mxu1 %v2607_v34 }
 0x138   :  { %832 = vmatpush1.bf16.msra.mxu1 %v2605_v35 }
 0x139   :  { %833 = vmatprep.subr.bf16.mxu1 %v2610_v36 }
 0x13c   :  { %834 = vmatpush1.bf16.msra.mxu1 %v2608_v37 }
 0x13d   :  { %835 = vmatprep.subr.bf16.mxu1 %v2613_v38 }
 0x140   :  { %836 = vmatpush1.bf16.msra.mxu1 %v2611_v39  ;;  %v2822_v39 = vmov 1966171168  }
 0x141   :  { %837 = vmatprep.subr.bf16.mxu1 %v2616_v40  ;;  %v441_v40 = vunpack.c.l.s4 %v2822_v39  ;;  %v2692_v39 = vld [vmem:[#allocation7 + $0x328] ss:$16 sps:$4 sm:$0xff]  }
 0x144   :  { %838 = vmatpush1.bf16.msra.mxu1 %v2614_v41  ;;  %v443_v41 = vlaneseq }
 0x145   :  { %839 = vmatprep.subr.bf16.mxu1 %v2619_v42  ;;  %v442_v42 = vunpack.c.0.s8 %v441_v40 }
 0x148   :  { %840 = vmatpush1.bf16.msra.mxu1 %v2617_v43  ;;  %v2899_v43 = vshrl.u32 %v443_v41, 7 }
 0x149   :  { %841 = vmatprep.subr.bf16.mxu1 %v2622_v44 }
 0x14c   :  { %842 = vmatpush1.bf16.msra.mxu1 %v2620_v45  ;;  %v2902_v45 = vsub.s32 %v442_v42, %v2899_v43 }
 0x14d   :  { %843 = vmatprep.subr.bf16.mxu1 %v2625_v46 }
 0x150   :  { %844 = vmatpush1.bf16.msra.mxu1 %v2623_v47 }
 0x151   :  { %845 = vmatprep.subr.bf16.mxu1 %v2628_v48 }
 0x154   :  { %846 = vmatpush1.bf16.msra.mxu1 %v2626_v49  ;;  %v396_v49 = vld [vmem:[#allocation9 + $0x3] sm:$0x3] }
 0x155   :  { %847 = vmatprep.subr.bf16.mxu1 %v2631_v50 }
 0x158   :  { %848 = vmatpush1.bf16.msra.mxu1 %v2629_v51  ;;  %v2907_v51 = vsub.s32 0, %v2899_v43 }
 0x159   :  { %849 = vmatprep.subr.bf16.mxu1 %v2634_v52  ;;  %v2910_v52 = vsub.s32 1, %v2899_v43 }
 0x15c   :  { %850 = vmatpush1.bf16.msra.mxu1 %v2632_v53 }
 0x15d   :  { %851 = vmatprep.subr.bf16.mxu1 %v2637_v54 }
 0x160   :  { %852 = vmatpush1.bf16.msra.mxu1 %v2635_v55 }
 0x161   :  { %853 = vmatprep.subr.bf16.mxu1 %v2640_v56 }
 0x164   :  { %854 = vmatpush1.bf16.msra.mxu1 %v2638_v57 }
 0x165   :  { %855 = vmatprep.subr.bf16.mxu1 %v2643_v58 }
 0x168   :  { %856 = vmatpush1.bf16.msra.mxu1 %v2641_v59 }
 0x169   :  { %857 = vmatprep.subr.bf16.mxu1 %v2646_v60 }
 0x16c   :  { %858 = vmatpush1.bf16.msra.mxu1 %v2644_v61 }
 0x16d   :  { %868 = vmatprep.subr.bf16.mxu1 %v2649_v62  ;;  %v397_v62 = vld [vmem:[#allocation9 + $0x5] sm:$0x3] }
 0x202   :  { %v389_v63 = vpop.f32.mrb[0].mxu1 }
 0x203   :  { %v398_v0 = vrot.slane %v389_v63, 4  ;;  %v413_v1 = vmul.f32 %v389_v63, %v389_v63  ;;  %v391_v2 = vpop.f32.mrb[1].mxu1 }
 0x204   :  { %v404_v3 = vrot.slane %v391_v2, 4  ;;  %v414_v4 = vmul.f32 %v391_v2, %v391_v2  ;;  %v393_v5 = vpop.f32.mrb[2].mxu1 }
 0x205   :  { %v399_v6 = vadd.f32 %v398_v0, %v389_v63  ;;  %v415_v7 = vrot.slane %v413_v1, 4  ;;  %v394_v8 = vpop.f32.mrb[3].mxu1 }
 0x206   :  { %v405_v9 = vadd.f32 %v404_v3, %v391_v2  ;;  %v421_v10 = vrot.slane %v414_v4, 4 }
 0x207   :  { %v400_v11 = vrot.slane %v399_v6, 2  ;;  %v416_v12 = vadd.f32 %v415_v7, %v413_v1 }
 0x208   :  { %v406_v13 = vrot.slane %v405_v9, 2  ;;  %v422_v14 = vadd.f32 %v421_v10, %v414_v4  ;;  %v2647_v10 = vld [vmem:[#allocation7 + $0x148] ss:$16 sps:$4 sm:$0xff]  }
 0x209   :  { %v401_v15 = vadd.f32 %v400_v11, %v399_v6  ;;  %v417_v16 = vrot.slane %v416_v12, 2 }
 0x20a   :  { %v407_v17 = vadd.f32 %v406_v13, %v405_v9  ;;  %v423_v18 = vrot.slane %v422_v14, 2  ;;  %v2653_v13 = vld [vmem:[#allocation7 + $0x188] ss:$16 sps:$4 sm:$0xff]  }
 0x20b   :  { %v402_v19 = vrot.slane %v401_v15, 1  ;;  %v418_v20 = vadd.f32 %v417_v16, %v416_v12  ;;  %v2655_v12 = vld [vmem:[#allocation7 + $0x18c] ss:$16 sps:$4 sm:$0xff]  }
 0x20c   :  { %v408_v21 = vrot.slane %v407_v17, 1  ;;  %v424_v22 = vadd.f32 %v423_v18, %v422_v14  ;;  %v2658_v14 = vld [vmem:[#allocation7 + $0x1ac] ss:$16 sps:$4 sm:$0xff]  }
 0x20d   :  { %v403_v23 = vadd.f32 %v402_v19, %v401_v15  ;;  %v419_v24 = vrot.slane %v418_v20, 1  ;;  %v2656_v15 = vld [vmem:[#allocation7 + $0x1a8] ss:$16 sps:$4 sm:$0xff]   ;;  %v2661_v16 = vld [vmem:[#allocation7 + $0x1cc] ss:$16 sps:$4 sm:$0xff]  }
 0x20e   :  { %v409_v25 = vadd.f32 %v408_v21, %v407_v17  ;;  %v425_v26 = vrot.slane %v424_v22, 1  ;;  %v2659_v17 = vld [vmem:[#allocation7 + $0x1c8] ss:$16 sps:$4 sm:$0xff]   ;;  %v2664_v18 = vld [vmem:[#allocation7 + $0x1ec] ss:$16 sps:$4 sm:$0xff]  }
 0x20f   :  { %v411_v27 = vmul.f32 0.125, %v403_v23  ;;  %v420_v28 = vadd.f32 %v419_v24, %v418_v20  ;;  %v2662_v19 = vld [vmem:[#allocation7 + $0x1e8] ss:$16 sps:$4 sm:$0xff]   ;;  %v2667_v20 = vld [vmem:[#allocation7 + $0x20c] ss:$16 sps:$4 sm:$0xff]  }
 0x210   :  { %v412_v29 = vmul.f32 0.125, %v409_v25  ;;  %v426_v30 = vadd.f32 %v425_v26, %v424_v22  ;;  %v2665_v21 = vld [vmem:[#allocation7 + $0x208] ss:$16 sps:$4 sm:$0xff]   ;;  %v2670_v22 = vld [vmem:[#allocation7 + $0x22c] ss:$16 sps:$4 sm:$0xff]  }
 0x211   :  { %v427_v31 = vmul.f32 0.125, %v420_v28  ;;  %v429_v32 = vmul.f32 %v411_v27, %v411_v27  ;;  %v2668_v23 = vld [vmem:[#allocation7 + $0x228] ss:$16 sps:$4 sm:$0xff]   ;;  %v2673_v24 = vld [vmem:[#allocation7 + $0x24c] ss:$16 sps:$4 sm:$0xff]  }
 0x212   :  { %v428_v33 = vmul.f32 0.125, %v426_v30  ;;  %v430_v34 = vmul.f32 %v412_v29, %v412_v29  ;;  %v2671_v25 = vld [vmem:[#allocation7 + $0x248] ss:$16 sps:$4 sm:$0xff]   ;;  %v2676_v26 = vld [vmem:[#allocation7 + $0x26c] ss:$16 sps:$4 sm:$0xff]  }
 0x213   :  { %v431_v35 = vsub.f32 %v427_v31, %v429_v32  ;;  %v2679_v28 = vld [vmem:[#allocation7 + $0x28c] ss:$16 sps:$4 sm:$0xff]   ;;  %v2680_v31 = vld [vmem:[#allocation7 + $0x2a8] ss:$16 sps:$4 sm:$0xff]  }
 0x214   :  { %v432_v36 = vsub.f32 %v428_v33, %v430_v34  ;;  %v2682_v30 = vld [vmem:[#allocation7 + $0x2ac] ss:$16 sps:$4 sm:$0xff]   ;;  %v2683_v33 = vld [vmem:[#allocation7 + $0x2c8] ss:$16 sps:$4 sm:$0xff]  }
 0x215   :  { %v433_v37 = vadd.f32 1e-05, %v431_v35  ;;  %v2685_v32 = vld [vmem:[#allocation7 + $0x2cc] ss:$16 sps:$4 sm:$0xff]   ;;  %v2686_v35 = vld [vmem:[#allocation7 + $0x2e8] ss:$16 sps:$4 sm:$0xff]  }
 0x216   :  { %v434_v38 = vadd.f32 1e-05, %v432_v36  ;;  %v2688_v34 = vld [vmem:[#allocation7 + $0x2ec] ss:$16 sps:$4 sm:$0xff]  }
 0x217   :  { %2695 = vrsqrt.f32 %v433_v37  ;;  %v2691_v36 = vld [vmem:[#allocation7 + $0x30c] ss:$16 sps:$4 sm:$0xff]   ;;  %v2689_v37 = vld [vmem:[#allocation7 + $0x308] ss:$16 sps:$4 sm:$0xff]  }
 0x218   :  { %2697 = vrsqrt.f32 %v434_v38  ;;  %v2694_v38 = vld [vmem:[#allocation7 + $0x32c] ss:$16 sps:$4 sm:$0xff]  }
 0x221   :  { %v2696_v44 = vpop.eup %2695 }
 0x222   :  { %v2698_v46 = vpop.eup %2697 }
 0x223   :  { %v439_v47 = vcombine.low %v2696_v44, %v2698_v46 }
 0x225   :  { %v446_v48 = vrot.slane %v439_v47, %v2902_v45 }
 0x227   :  { %v453_v50 = vrot.slane %v446_v48, %v2902_v45 }
 0x229   :  { %v455_v53 = vmul.f32 %v453_v50, %v396_v49 }
 0x22b   :  { %v460_v54 = vrot.slane %v455_v53, %v2907_v51  ;;  %v464_v55 = vrot.slane %v455_v53, %v2910_v52 }
 0x22d   :  { %v467_v56 = vmul.f32 %v460_v54, %v411_v27  ;;  %v468_v57 = vmul.f32 %v464_v55, %v412_v29  ;;  %v489_v58 = vmul.f32 %v464_v55, %v391_v2  ;;  %v488_v59 = vmul.f32 %v460_v54, %v389_v63  ;;  %v2652_v63 = vld [vmem:[#allocation7 + $0x16c] ss:$16 sps:$4 sm:$0xff]   ;;  %v2650_v2 = vld [vmem:[#allocation7 + $0x168] ss:$16 sps:$4 sm:$0xff]  }
 0x22e   :  { %v2674_v27 = vld [vmem:[#allocation7 + $0x268] ss:$16 sps:$4 sm:$0xff]  }
 0x22f   :  { %v471_v60 = vcombine.low %v467_v56, %v468_v57  ;;  %v2677_v29 = vld [vmem:[#allocation7 + $0x288] ss:$16 sps:$4 sm:$0xff]  }
 0x231   :  { %v478_v61 = vrot.slane %v471_v60, %v2902_v45 }
 0x233   :  { %v485_v0 = vrot.slane %v478_v61, %v2902_v45 }
 0x235   :  { %v487_v1 = vsub.f32 %v397_v62, %v485_v0 }
 0x237   :  { %v498_v3 = vrot.slane %v487_v1, %v2910_v52  ;;  %v494_v4 = vrot.slane %v487_v1, %v2907_v51 }
 0x239   :  { %v502_v5 = vadd.f32 %v498_v3, %v489_v58  ;;  %v501_v6 = vadd.f32 %v494_v4, %v488_v59 }
 0x23b   :  { %v504_v7 = vmax.f32 %v502_v5, 0.0  ;;  %v503_v8 = vmax.f32 %v501_v6, 0.0 }
 0x23d   :  { %v506_v9 = vpack.c.bf16 %v504_v7, %v504_v7  ;;  %v2918_v11 = vpack.c.bf16 %v503_v8, %v503_v8 }
 0x23f   :  { %859 = vmatprep.mubr.bf16.mxu1 %v506_v9 }
 0x240   :  { %860 = vmatmul.mubr.bf16.vlgmr.msra.gmra.mrb[4].mxu1 %v2918_v11 }
 0x241   :  { %869 = vmatpush1.bf16.msra.mxu1 %v2647_v10  ;;  %900 = vmatprep.mubr.bf16.mxu1 %v506_v9 }
 0x242   :  { %870 = vmatprep.subr.bf16.mxu1 %v2652_v63 }
 0x245   :  { %871 = vmatpush1.bf16.msra.mxu1 %v2650_v2 }
 0x246   :  { %872 = vmatprep.subr.bf16.mxu1 %v2655_v12 }
 0x249   :  { %873 = vmatpush1.bf16.msra.mxu1 %v2653_v13 }
 0x24a   :  { %874 = vmatprep.subr.bf16.mxu1 %v2658_v14 }
 0x24d   :  { %875 = vmatpush1.bf16.msra.mxu1 %v2656_v15 }
 0x24e   :  { %876 = vmatprep.subr.bf16.mxu1 %v2661_v16 }
 0x251   :  { %877 = vmatpush1.bf16.msra.mxu1 %v2659_v17 }
 0x252   :  { %878 = vmatprep.subr.bf16.mxu1 %v2664_v18 }
 0x255   :  { %879 = vmatpush1.bf16.msra.mxu1 %v2662_v19 }
 0x256   :  { %880 = vmatprep.subr.bf16.mxu1 %v2667_v20 }
 0x259   :  { %881 = vmatpush1.bf16.msra.mxu1 %v2665_v21 }
 0x25a   :  { %882 = vmatprep.subr.bf16.mxu1 %v2670_v22 }
 0x25d   :  { %883 = vmatpush1.bf16.msra.mxu1 %v2668_v23 }
 0x25e   :  { %884 = vmatprep.subr.bf16.mxu1 %v2673_v24 }
 0x261   :  { %885 = vmatpush1.bf16.msra.mxu1 %v2671_v25 }
 0x262   :  { %886 = vmatprep.subr.bf16.mxu1 %v2676_v26 }
 0x265   :  { %887 = vmatpush1.bf16.msra.mxu1 %v2674_v27 }
 0x266   :  { %888 = vmatprep.subr.bf16.mxu1 %v2679_v28 }
 0x269   :  { %889 = vmatpush1.bf16.msra.mxu1 %v2677_v29 }
 0x26a   :  { %890 = vmatprep.subr.bf16.mxu1 %v2682_v30 }
 0x26d   :  { %891 = vmatpush1.bf16.msra.mxu1 %v2680_v31 }
 0x26e   :  { %892 = vmatprep.subr.bf16.mxu1 %v2685_v32 }
 0x271   :  { %893 = vmatpush1.bf16.msra.mxu1 %v2683_v33 }
 0x272   :  { %894 = vmatprep.subr.bf16.mxu1 %v2688_v34 }
 0x275   :  { %895 = vmatpush1.bf16.msra.mxu1 %v2686_v35 }
 0x276   :  { %896 = vmatprep.subr.bf16.mxu1 %v2691_v36 }
 0x279   :  { %897 = vmatpush1.bf16.msra.mxu1 %v2689_v37 }
 0x27a   :  { %898 = vmatprep.subr.bf16.mxu1 %v2694_v38 }
 0x27d   :  { %899 = vmatpush1.bf16.msra.mxu1 %v2692_v39 }
 0x280   :  { %901 = vmatmul.mubr.bf16.vlgmr.msra.gmra.mrb[8].mxu1 %v2918_v11 }
 0x313   :  { %v2922_v40 = vpop.f32.mrb[4].mxu1 }
 0x314   :  { %v911_v41 = vrot.slane %v2922_v40, 4  ;;  %v939_v42 = vmul.f32 %v2922_v40, %v2922_v40  ;;  %v2927_v44 = vpop.f32.mrb[5].mxu1 }
 0x315   :  { %v917_v46 = vrot.slane %v2927_v44, 4  ;;  %v940_v47 = vmul.f32 %v2927_v44, %v2927_v44  ;;  %v865_v48 = vpop.f32.mrb[6].mxu1 }
 0x316   :  { %v912_v49 = vadd.f32 %v911_v41, %v2922_v40  ;;  %v943_v50 = vrot.slane %v939_v42, 4  ;;  %v866_v53 = vpop.f32.mrb[7].mxu1 }
 0x317   :  { %v918_v54 = vadd.f32 %v917_v46, %v2927_v44  ;;  %v949_v55 = vrot.slane %v940_v47, 4 }
 0x318   :  { %v913_v56 = vrot.slane %v912_v49, 2  ;;  %v944_v57 = vadd.f32 %v943_v50, %v939_v42 }
 0x319   :  { %v919_v58 = vrot.slane %v918_v54, 2  ;;  %v950_v59 = vadd.f32 %v949_v55, %v940_v47 }
 0x31a   :  { %v914_v60 = vadd.f32 %v913_v56, %v912_v49  ;;  %v945_v61 = vrot.slane %v944_v57, 2 }
 0x31b   :  { %v920_v62 = vadd.f32 %v919_v58, %v918_v54  ;;  %v951_v0 = vrot.slane %v950_v59, 2 }
 0x31c   :  { %v915_v1 = vrot.slane %v914_v60, 1  ;;  %v946_v3 = vadd.f32 %v945_v61, %v944_v57 }
 0x31d   :  { %v921_v4 = vrot.slane %v920_v62, 1  ;;  %v952_v5 = vadd.f32 %v951_v0, %v950_v59 }
 0x31e   :  { %v916_v6 = vadd.f32 %v915_v1, %v914_v60  ;;  %v947_v7 = vrot.slane %v946_v3, 1 }
 0x31f   :  { %v922_v8 = vadd.f32 %v921_v4, %v920_v62  ;;  %v953_v9 = vrot.slane %v952_v5, 1 }
 0x320   :  { %v2934_v10 = vmul.f32 0.125, %v916_v6  ;;  %v948_v11 = vadd.f32 %v947_v7, %v946_v3 }
 0x321   :  { %v2936_v63 = vmul.f32 0.125, %v922_v8  ;;  %v954_v2 = vadd.f32 %v953_v9, %v952_v5 }
 0x322   :  { %v967_v12 = vmul.f32 0.125, %v948_v11  ;;  %v971_v13 = vmul.f32 %v2934_v10, %v2934_v10 }
 0x323   :  { %v968_v14 = vmul.f32 0.125, %v954_v2  ;;  %v972_v15 = vmul.f32 %v2936_v63, %v2936_v63 }
 0x324   :  { %v975_v16 = vsub.f32 %v967_v12, %v971_v13  ;;  %v909_v13 = vld [vmem:[#allocation9 + $0x7] sm:$0xf] }
 0x325   :  { %v976_v17 = vsub.f32 %v968_v14, %v972_v15  ;;  %v2952_v15 = vsub.s32 2, %v2899_v43 }
 0x326   :  { %v979_v18 = vadd.f32 1e-05, %v975_v16  ;;  %v2955_v16 = vsub.s32 3, %v2899_v43 }
 0x327   :  { %v980_v19 = vadd.f32 1e-05, %v976_v17 }
 0x328   :  { %2699 = vrsqrt.f32 %v979_v18 }
 0x329   :  { %2701 = vrsqrt.f32 %v980_v19 }
 0x332   :  { %v2700_v20 = vpop.eup %2699 }
 0x333   :  { %v2702_v21 = vpop.eup %2701 }
 0x334   :  { %v991_v22 = vcombine.low %v2700_v20, %v2702_v21 }
 0x336   :  { %v999_v11 = vrot.slane %v991_v22, %v2902_v45 }
 0x353   :  { %v2942_v23 = vpop.f32.mrb[8].mxu1 }
 0x354   :  { %v923_v24 = vrot.slane %v2942_v23, 4  ;;  %v941_v25 = vmul.f32 %v2942_v23, %v2942_v23  ;;  %v904_v26 = vpop.f32.mrb[9].mxu1 }
 0x355   :  { %v929_v27 = vrot.slane %v904_v26, 4  ;;  %v942_v28 = vmul.f32 %v904_v26, %v904_v26  ;;  %v906_v29 = vpop.f32.mrb[10].mxu1 }
 0x356   :  { %v924_v30 = vadd.f32 %v923_v24, %v2942_v23  ;;  %v955_v31 = vrot.slane %v941_v25, 4  ;;  %v907_v32 = vpop.f32.mrb[11].mxu1 }
 0x357   :  { %v930_v33 = vadd.f32 %v929_v27, %v904_v26  ;;  %v961_v34 = vrot.slane %v942_v28, 4 }
 0x358   :  { %v925_v35 = vrot.slane %v924_v30, 2  ;;  %v956_v36 = vadd.f32 %v955_v31, %v941_v25 }
 0x359   :  { %v931_v37 = vrot.slane %v930_v33, 2  ;;  %v962_v38 = vadd.f32 %v961_v34, %v942_v28 }
 0x35a   :  { %v926_v39 = vadd.f32 %v925_v35, %v924_v30  ;;  %v957_v41 = vrot.slane %v956_v36, 2 }
 0x35b   :  { %v932_v42 = vadd.f32 %v931_v37, %v930_v33  ;;  %v963_v46 = vrot.slane %v962_v38, 2  ;;  %v910_v37 = vld [vmem:[#allocation9 + $0xb] sm:$0xf] }
 0x35c   :  { %v927_v47 = vrot.slane %v926_v39, 1  ;;  %v958_v48 = vadd.f32 %v957_v41, %v956_v36 }
 0x35d   :  { %v933_v49 = vrot.slane %v932_v42, 1  ;;  %v964_v50 = vadd.f32 %v963_v46, %v962_v38 }
 0x35e   :  { %v928_v53 = vadd.f32 %v927_v47, %v926_v39  ;;  %v959_v54 = vrot.slane %v958_v48, 1 }
 0x35f   :  { %v934_v55 = vadd.f32 %v933_v49, %v932_v42  ;;  %v965_v56 = vrot.slane %v964_v50, 1 }
 0x360   :  { %v937_v57 = vmul.f32 0.125, %v928_v53  ;;  %v960_v58 = vadd.f32 %v959_v54, %v958_v48 }
 0x361   :  { %v938_v59 = vmul.f32 0.125, %v934_v55  ;;  %v966_v60 = vadd.f32 %v965_v56, %v964_v50 }
 0x362   :  { %v969_v61 = vmul.f32 0.125, %v960_v58  ;;  %v973_v62 = vmul.f32 %v937_v57, %v937_v57 }
 0x363   :  { %v970_v0 = vmul.f32 0.125, %v966_v60  ;;  %v974_v1 = vmul.f32 %v938_v59, %v938_v59 }
 0x364   :  { %v977_v3 = vsub.f32 %v969_v61, %v973_v62 }
 0x365   :  { %v978_v4 = vsub.f32 %v970_v0, %v974_v1 }
 0x366   :  { %v981_v5 = vadd.f32 1e-05, %v977_v3 }
 0x367   :  { %v982_v6 = vadd.f32 1e-05, %v978_v4 }
 0x368   :  { %2703 = vrsqrt.f32 %v981_v5 }
 0x369   :  { %2705 = vrsqrt.f32 %v982_v6 }
 0x372   :  { %v2704_v7 = vpop.eup %2703 }
 0x373   :  { %v2706_v8 = vpop.eup %2705 }
 0x374   :  { %v992_v9 = vcombine.low %v2704_v7, %v2706_v8 }
 0x376   :  { %v1006_v2 = vrot.slane %v992_v9, %v2902_v45 }
 0x378   :  { %v1007_v12 = vcombine.low %v999_v11, %v1006_v2 }
 0x37a   :  { %v1014_v14 = vrot.slane %v1007_v12, %v2902_v45 }
 0x37c   :  { %v1016_v17 = vmul.f32 %v1014_v14, %v909_v13 }
 0x37e   :  { %v1021_v18 = vrot.slane %v1016_v17, %v2907_v51  ;;  %v1025_v19 = vrot.slane %v1016_v17, %v2910_v52  ;;  %v1029_v20 = vrot.slane %v1016_v17, %v2952_v15  ;;  %v1033_v21 = vrot.slane %v1016_v17, %v2955_v16 }
 0x380   :  { %v1038_v22 = vmul.f32 %v1021_v18, %v2934_v10  ;;  %v1039_v24 = vmul.f32 %v1025_v19, %v2936_v63  ;;  %v1040_v25 = vmul.f32 %v1029_v20, %v937_v57  ;;  %v1041_v27 = vmul.f32 %v1033_v21, %v938_v59 }
 0x381   :  { %v1072_v28 = vmul.f32 %v1021_v18, %v2922_v40  ;;  %v1073_v29 = vmul.f32 %v1025_v19, %v2927_v44  ;;  %v1074_v30 = vmul.f32 %v1029_v20, %v2942_v23  ;;  %v1075_v31 = vmul.f32 %v1033_v21, %v904_v26 }
 0x382   :  { %v1046_v32 = vcombine.low %v1038_v22, %v1039_v24  ;;  %v1047_v33 = vcombine.low %v1040_v25, %v1041_v27 }
 0x384   :  { %v1054_v34 = vrot.slane %v1046_v32, %v2902_v45  ;;  %v1061_v35 = vrot.slane %v1047_v33, %v2902_v45 }
 0x386   :  { %v1062_v36 = vcombine.low %v1054_v34, %v1061_v35 }
 0x388   :  { %v1069_v10 = vrot.slane %v1062_v36, %v2902_v45 }
 0x38a   :  { %v1071_v63 = vsub.f32 %v910_v37, %v1069_v10 }
 0x38c   :  { %v1080_v38 = vrot.slane %v1071_v63, %v2907_v51  ;;  %v1084_v40 = vrot.slane %v1071_v63, %v2910_v52  ;;  %v1088_v44 = vrot.slane %v1071_v63, %v2952_v15  ;;  %v1092_v23 = vrot.slane %v1071_v63, %v2955_v16 }
 0x38e   :  { %v2973_v26 = vadd.f32 %v1080_v38, %v1072_v28  ;;  %v1098_v39 = vadd.f32 %v1084_v40, %v1073_v29  ;;  %v2975_v41 = vadd.f32 %v1088_v44, %v1074_v30  ;;  %v1100_v42 = vadd.f32 %v1092_v23, %v1075_v31 }
 0x390   :  { %v1101_v46 = vmax.f32 %v2973_v26, 0.0  ;;  %v1102_v47 = vmax.f32 %v1098_v39, 0.0  ;;  %v1103_v48 = vmax.f32 %v2975_v41, 0.0  ;;  %v1104_v49 = vmax.f32 %v1100_v42, 0.0 }
 0x391   :  { %2797 = dma.done.wait [#allocation4], 32768 }
 0x392   :  { %2798 = vsyncadd [#allocation4], 4294934528  ;;  %v2979_v50 = vpack.c.bf16 %v1102_v47, %v1102_v47  ;;  %v2981_v53 = vpack.c.bf16 %v1104_v49, %v1104_v49  ;;  %v1110_v54 = vld [vmem:[#allocation2 + $0x8] sm:$0xff]  ;;  %v1109_v56 = vld [vmem:[#allocation2] sm:$0xff] }
 0x393   :  { %v1238_v55 = vld [vmem:[#allocation2 + $0x408] sm:$0xff]  ;;  %1369 = vmatprep.subr.bf16.mxu1 %v1110_v54  ;;  %v1237_v57 = vld [vmem:[#allocation2 + $0x400] sm:$0xff]  ;;  %v1119_v26 = vld [vmem:[#allocation2 + $0x50] sm:$0xff] }
 0x394   :  { %1401 = vmatprep.mubr.bf16.mxu1 %v2979_v50  ;;  %1442 = vmatprep.mubr.bf16.mxu0 %v2981_v53  ;;  %v1118_v58 = vld [vmem:[#allocation2 + $0x48] sm:$0xff]  ;;  %v1117_v60 = vld [vmem:[#allocation2 + $0x40] sm:$0xff] }
 0x395   :  { %1410 = vmatprep.subr.bf16.mxu0 %v1238_v55  ;;  %v1246_v59 = vld [vmem:[#allocation2 + $0x448] sm:$0xff]  ;;  %1370 = vmatpush1.bf16.msra.mxu1 %v1109_v56  ;;  %v1245_v61 = vld [vmem:[#allocation2 + $0x440] sm:$0xff] }
 0x396   :  { %1411 = vmatpush1.bf16.msra.mxu0 %v1237_v57  ;;  %1371 = vmatprep.subr.bf16.mxu1 %v1118_v58  ;;  %v1126_v62 = vld [vmem:[#allocation2 + $0x88] sm:$0xff]  ;;  %v1125_v1 = vld [vmem:[#allocation2 + $0x80] sm:$0xff] }
 0x397   :  { %1412 = vmatprep.subr.bf16.mxu0 %v1246_v59  ;;  %v1254_v0 = vld [vmem:[#allocation2 + $0x488] sm:$0xff]  ;;  %v1253_v3 = vld [vmem:[#allocation2 + $0x480] sm:$0xff] }
 0x398   :  { %v1134_v4 = vld [vmem:[#allocation2 + $0xc8] sm:$0xff]  ;;  %v1133_v6 = vld [vmem:[#allocation2 + $0xc0] sm:$0xff] }
 0x399   :  { %1372 = vmatpush1.bf16.msra.mxu1 %v1117_v60  ;;  %v1262_v5 = vld [vmem:[#allocation2 + $0x4c8] sm:$0xff]  ;;  %v1261_v7 = vld [vmem:[#allocation2 + $0x4c0] sm:$0xff] }
 0x39a   :  { %1413 = vmatpush1.bf16.msra.mxu0 %v1245_v61  ;;  %1373 = vmatprep.subr.bf16.mxu1 %v1126_v62  ;;  %v1142_v8 = vld [vmem:[#allocation2 + $0x108] sm:$0xff]  ;;  %v1141_v11 = vld [vmem:[#allocation2 + $0x100] sm:$0xff] }
 0x39b   :  { %1414 = vmatprep.subr.bf16.mxu0 %v1254_v0  ;;  %v1270_v9 = vld [vmem:[#allocation2 + $0x508] sm:$0xff]  ;;  %v1269_v2 = vld [vmem:[#allocation2 + $0x500] sm:$0xff] }
 0x39c   :  { %v1150_v12 = vld [vmem:[#allocation2 + $0x148] sm:$0xff]  ;;  %v1149_v14 = vld [vmem:[#allocation2 + $0x140] sm:$0xff] }
 0x39d   :  { %1374 = vmatpush1.bf16.msra.mxu1 %v1125_v1  ;;  %v1278_v13 = vld [vmem:[#allocation2 + $0x548] sm:$0xff]  ;;  %v1277_v17 = vld [vmem:[#allocation2 + $0x540] sm:$0xff] }
 0x39e   :  { %1415 = vmatpush1.bf16.msra.mxu0 %v1253_v3  ;;  %1375 = vmatprep.subr.bf16.mxu1 %v1134_v4  ;;  %v1158_v18 = vld [vmem:[#allocation2 + $0x188] sm:$0xff]  ;;  %v1157_v20 = vld [vmem:[#allocation2 + $0x180] sm:$0xff]  ;;  %v1112_v4 = vld [vmem:[#allocation2 + $0x18] sm:$0xff] }
 0x39f   :  { %1416 = vmatprep.subr.bf16.mxu0 %v1262_v5  ;;  %v1286_v19 = vld [vmem:[#allocation2 + $0x588] sm:$0xff]  ;;  %v1285_v21 = vld [vmem:[#allocation2 + $0x580] sm:$0xff] }
 0x3a0   :  { %v1166_v22 = vld [vmem:[#allocation2 + $0x1c8] sm:$0xff]  ;;  %v1165_v25 = vld [vmem:[#allocation2 + $0x1c0] sm:$0xff] }
 0x3a1   :  { %1376 = vmatpush1.bf16.msra.mxu1 %v1133_v6  ;;  %v1294_v24 = vld [vmem:[#allocation2 + $0x5c8] sm:$0xff]  ;;  %v1293_v27 = vld [vmem:[#allocation2 + $0x5c0] sm:$0xff]  ;;  %v2988_v6 = vpack.c.bf16 %v1101_v46, %v1101_v46  ;;  %v1128_v46 = vld [vmem:[#allocation2 + $0x98] sm:$0xff] }
 0x3a2   :  { %1417 = vmatpush1.bf16.msra.mxu0 %v1261_v7  ;;  %1377 = vmatprep.subr.bf16.mxu1 %v1142_v8  ;;  %v1174_v28 = vld [vmem:[#allocation2 + $0x208] sm:$0xff]  ;;  %v1173_v30 = vld [vmem:[#allocation2 + $0x200] sm:$0xff]  ;;  %v2993_v7 = vpack.c.bf16 %v1103_v48, %v1103_v48  ;;  %v1111_v8 = vld [vmem:[#allocation2 + $0x10] sm:$0xff] }
 0x3a3   :  { %1418 = vmatprep.subr.bf16.mxu0 %v1270_v9  ;;  %v1302_v29 = vld [vmem:[#allocation2 + $0x608] sm:$0xff]  ;;  %v1301_v31 = vld [vmem:[#allocation2 + $0x600] sm:$0xff] }
 0x3a4   :  { %v1182_v32 = vld [vmem:[#allocation2 + $0x248] sm:$0xff]  ;;  %v1181_v34 = vld [vmem:[#allocation2 + $0x240] sm:$0xff] }
 0x3a5   :  { %1378 = vmatpush1.bf16.msra.mxu1 %v1141_v11  ;;  %v1310_v33 = vld [vmem:[#allocation2 + $0x648] sm:$0xff]  ;;  %v1309_v35 = vld [vmem:[#allocation2 + $0x640] sm:$0xff]  ;;  %v1120_v11 = vld [vmem:[#allocation2 + $0x58] sm:$0xff] }
 0x3a6   :  { %1419 = vmatpush1.bf16.msra.mxu0 %v1269_v2  ;;  %1379 = vmatprep.subr.bf16.mxu1 %v1150_v12  ;;  %v1190_v36 = vld [vmem:[#allocation2 + $0x288] sm:$0xff]  ;;  %v1189_v10 = vld [vmem:[#allocation2 + $0x280] sm:$0xff]  ;;  %v1127_v12 = vld [vmem:[#allocation2 + $0x90] sm:$0xff] }
 0x3a7   :  { %1420 = vmatprep.subr.bf16.mxu0 %v1278_v13  ;;  %v1318_v37 = vld [vmem:[#allocation2 + $0x688] sm:$0xff]  ;;  %v1317_v63 = vld [vmem:[#allocation2 + $0x680] sm:$0xff] }
 0x3a8   :  { %v1198_v38 = vld [vmem:[#allocation2 + $0x2c8] sm:$0xff]  ;;  %v1197_v44 = vld [vmem:[#allocation2 + $0x2c0] sm:$0xff] }
 0x3a9   :  { %1380 = vmatpush1.bf16.msra.mxu1 %v1149_v14  ;;  %v1326_v40 = vld [vmem:[#allocation2 + $0x6c8] sm:$0xff]  ;;  %v1325_v23 = vld [vmem:[#allocation2 + $0x6c0] sm:$0xff]  ;;  %v1136_v14 = vld [vmem:[#allocation2 + $0xd8] sm:$0xff] }
 0x3aa   :  { %1421 = vmatpush1.bf16.msra.mxu0 %v1277_v17  ;;  %1381 = vmatprep.subr.bf16.mxu1 %v1158_v18  ;;  %v1206_v39 = vld [vmem:[#allocation2 + $0x308] sm:$0xff]  ;;  %v1205_v47 = vld [vmem:[#allocation2 + $0x300] sm:$0xff]  ;;  %v1135_v18 = vld [vmem:[#allocation2 + $0xd0] sm:$0xff] }
 0x3ab   :  { %1422 = vmatprep.subr.bf16.mxu0 %v1286_v19  ;;  %v1334_v42 = vld [vmem:[#allocation2 + $0x708] sm:$0xff]  ;;  %v1333_v49 = vld [vmem:[#allocation2 + $0x700] sm:$0xff] }
 0x3ac   :  { %v1214_v54 = vld [vmem:[#allocation2 + $0x348] sm:$0xff]  ;;  %v1213_v56 = vld [vmem:[#allocation2 + $0x340] sm:$0xff] }
 0x3ad   :  { %1382 = vmatpush1.bf16.msra.mxu1 %v1157_v20  ;;  %v1342_v55 = vld [vmem:[#allocation2 + $0x748] sm:$0xff]  ;;  %v1341_v57 = vld [vmem:[#allocation2 + $0x740] sm:$0xff]  ;;  %v1144_v20 = vld [vmem:[#allocation2 + $0x118] sm:$0xff] }
 0x3ae   :  { %1423 = vmatpush1.bf16.msra.mxu0 %v1285_v21  ;;  %1383 = vmatprep.subr.bf16.mxu1 %v1166_v22  ;;  %v1222_v58 = vld [vmem:[#allocation2 + $0x388] sm:$0xff]  ;;  %v1221_v60 = vld [vmem:[#allocation2 + $0x380] sm:$0xff]  ;;  %v1143_v22 = vld [vmem:[#allocation2 + $0x110] sm:$0xff] }
 0x3af   :  { %1424 = vmatprep.subr.bf16.mxu0 %v1294_v24  ;;  %v1350_v59 = vld [vmem:[#allocation2 + $0x788] sm:$0xff]  ;;  %v1349_v61 = vld [vmem:[#allocation2 + $0x780] sm:$0xff] }
 0x3b0   :  { %v1230_v62 = vld [vmem:[#allocation2 + $0x3c8] sm:$0xff]  ;;  %v1229_v1 = vld [vmem:[#allocation2 + $0x3c0] sm:$0xff] }
 0x3b1   :  { %1384 = vmatpush1.bf16.msra.mxu1 %v1165_v25  ;;  %v1358_v0 = vld [vmem:[#allocation2 + $0x7c8] sm:$0xff]  ;;  %v1357_v3 = vld [vmem:[#allocation2 + $0x7c0] sm:$0xff]  ;;  %v1152_v25 = vld [vmem:[#allocation2 + $0x158] sm:$0xff] }
 0x3b2   :  { %1425 = vmatpush1.bf16.msra.mxu0 %v1293_v27  ;;  %1385 = vmatprep.subr.bf16.mxu1 %v1174_v28  ;;  %v1114_v5 = vld [vmem:[#allocation2 + $0x28] sm:$0xff]  ;;  %v1113_v9 = vld [vmem:[#allocation2 + $0x20] sm:$0xff]  ;;  %v1151_v28 = vld [vmem:[#allocation2 + $0x150] sm:$0xff] }
 0x3b3   :  { %1426 = vmatprep.subr.bf16.mxu0 %v1302_v29  ;;  %v1122_v2 = vld [vmem:[#allocation2 + $0x68] sm:$0xff]  ;;  %v1121_v41 = vld [vmem:[#allocation2 + $0x60] sm:$0xff] }
 0x3b4   :  { %v1130_v48 = vld [vmem:[#allocation2 + $0xa8] sm:$0xff]  ;;  %v1129_v13 = vld [vmem:[#allocation2 + $0xa0] sm:$0xff] }
 0x3b5   :  { %1386 = vmatpush1.bf16.msra.mxu1 %v1173_v30  ;;  %v1138_v17 = vld [vmem:[#allocation2 + $0xe8] sm:$0xff]  ;;  %v1137_v19 = vld [vmem:[#allocation2 + $0xe0] sm:$0xff]  ;;  %v1160_v30 = vld [vmem:[#allocation2 + $0x198] sm:$0xff] }
 0x3b6   :  { %1427 = vmatpush1.bf16.msra.mxu0 %v1301_v31  ;;  %1387 = vmatprep.subr.bf16.mxu1 %v1182_v32  ;;  %v1146_v21 = vld [vmem:[#allocation2 + $0x128] sm:$0xff]  ;;  %v1145_v24 = vld [vmem:[#allocation2 + $0x120] sm:$0xff]  ;;  %v1159_v32 = vld [vmem:[#allocation2 + $0x190] sm:$0xff] }
 0x3b7   :  { %1428 = vmatprep.subr.bf16.mxu0 %v1310_v33  ;;  %v1154_v27 = vld [vmem:[#allocation2 + $0x168] sm:$0xff]  ;;  %v1153_v29 = vld [vmem:[#allocation2 + $0x160] sm:$0xff] }
 0x3b8   :  { %v1162_v31 = vld [vmem:[#allocation2 + $0x1a8] sm:$0xff]  ;;  %v1161_v33 = vld [vmem:[#allocation2 + $0x1a0] sm:$0xff] }
 0x3b9   :  { %1388 = vmatpush1.bf16.msra.mxu1 %v1181_v34  ;;  %v1168_v34 = vld [vmem:[#allocation2 + $0x1d8] sm:$0xff] }
 0x3ba   :  { %1429 = vmatpush1.bf16.msra.mxu0 %v1309_v35  ;;  %1389 = vmatprep.subr.bf16.mxu1 %v1190_v36  ;;  %v1170_v35 = vld [vmem:[#allocation2 + $0x1e8] sm:$0xff]  ;;  %v1167_v36 = vld [vmem:[#allocation2 + $0x1d0] sm:$0xff] }
 0x3bb   :  { %1430 = vmatprep.subr.bf16.mxu0 %v1318_v37  ;;  %v1169_v37 = vld [vmem:[#allocation2 + $0x1e0] sm:$0xff] }
 0x3bd   :  { %1390 = vmatpush1.bf16.msra.mxu1 %v1189_v10  ;;  %v1176_v10 = vld [vmem:[#allocation2 + $0x218] sm:$0xff] }
 0x3be   :  { %1431 = vmatpush1.bf16.msra.mxu0 %v1317_v63  ;;  %1391 = vmatprep.subr.bf16.mxu1 %v1198_v38  ;;  %v1178_v63 = vld [vmem:[#allocation2 + $0x228] sm:$0xff]  ;;  %v1175_v38 = vld [vmem:[#allocation2 + $0x210] sm:$0xff] }
 0x3bf   :  { %1432 = vmatprep.subr.bf16.mxu0 %v1326_v40  ;;  %v1177_v40 = vld [vmem:[#allocation2 + $0x220] sm:$0xff] }
 0x3c1   :  { %1392 = vmatpush1.bf16.msra.mxu1 %v1197_v44  ;;  %v1184_v44 = vld [vmem:[#allocation2 + $0x258] sm:$0xff] }
 0x3c2   :  { %1433 = vmatpush1.bf16.msra.mxu0 %v1325_v23  ;;  %1393 = vmatprep.subr.bf16.mxu1 %v1206_v39  ;;  %v1186_v23 = vld [vmem:[#allocation2 + $0x268] sm:$0xff]  ;;  %v1183_v39 = vld [vmem:[#allocation2 + $0x250] sm:$0xff] }
 0x3c3   :  { %1434 = vmatprep.subr.bf16.mxu0 %v1334_v42  ;;  %v1185_v42 = vld [vmem:[#allocation2 + $0x260] sm:$0xff] }
 0x3c5   :  { %1394 = vmatpush1.bf16.msra.mxu1 %v1205_v47  ;;  %v1192_v47 = vld [vmem:[#allocation2 + $0x298] sm:$0xff] }
 0x3c6   :  { %1435 = vmatpush1.bf16.msra.mxu0 %v1333_v49  ;;  %1395 = vmatprep.subr.bf16.mxu1 %v1214_v54  ;;  %v1194_v49 = vld [vmem:[#allocation2 + $0x2a8] sm:$0xff]  ;;  %v1191_v54 = vld [vmem:[#allocation2 + $0x290] sm:$0xff] }
 0x3c7   :  { %1436 = vmatprep.subr.bf16.mxu0 %v1342_v55  ;;  %v1193_v55 = vld [vmem:[#allocation2 + $0x2a0] sm:$0xff] }
 0x3c9   :  { %1396 = vmatpush1.bf16.msra.mxu1 %v1213_v56  ;;  %v1200_v56 = vld [vmem:[#allocation2 + $0x2d8] sm:$0xff] }
 0x3ca   :  { %1437 = vmatpush1.bf16.msra.mxu0 %v1341_v57  ;;  %1397 = vmatprep.subr.bf16.mxu1 %v1222_v58  ;;  %v1202_v57 = vld [vmem:[#allocation2 + $0x2e8] sm:$0xff]  ;;  %v1199_v58 = vld [vmem:[#allocation2 + $0x2d0] sm:$0xff] }
 0x3cb   :  { %1438 = vmatprep.subr.bf16.mxu0 %v1350_v59  ;;  %v1201_v59 = vld [vmem:[#allocation2 + $0x2e0] sm:$0xff] }
 0x3cd   :  { %1398 = vmatpush1.bf16.msra.mxu1 %v1221_v60  ;;  %v1208_v60 = vld [vmem:[#allocation2 + $0x318] sm:$0xff] }
 0x3ce   :  { %1439 = vmatpush1.bf16.msra.mxu0 %v1349_v61  ;;  %1399 = vmatprep.subr.bf16.mxu1 %v1230_v62  ;;  %v1210_v61 = vld [vmem:[#allocation2 + $0x328] sm:$0xff]  ;;  %v1207_v62 = vld [vmem:[#allocation2 + $0x310] sm:$0xff] }
 0x3cf   :  { %1440 = vmatprep.subr.bf16.mxu0 %v1358_v0  ;;  %v1209_v0 = vld [vmem:[#allocation2 + $0x320] sm:$0xff] }
 0x3d1   :  { %1400 = vmatpush1.bf16.msra.mxu1 %v1229_v1  ;;  %v1216_v1 = vld [vmem:[#allocation2 + $0x358] sm:$0xff] }
 0x3d2   :  { %1441 = vmatpush1.bf16.msra.mxu0 %v1357_v3  ;;  %1451 = vmatprep.subr.bf16.mxu1 %v1112_v4  ;;  %v1218_v3 = vld [vmem:[#allocation2 + $0x368] sm:$0xff]  ;;  %v1215_v4 = vld [vmem:[#allocation2 + $0x350] sm:$0xff] }
 0x3d3   :  { %1533 = vmatprep.subr.bf16.mxu0 %v1114_v5  ;;  %v1217_v5 = vld [vmem:[#allocation2 + $0x360] sm:$0xff] }
 0x3d4   :  { %1402 = vmatmul.mubr.bf16.vlgmr.msra.gmra.mrb[12].mxu1 %v2988_v6 }
 0x3d5   :  { %1443 = vmatmul.mubr.bf16.vlgmr.msra.gmra.mrb[4].mxu0 %v2993_v7  ;;  %1452 = vmatpush1.bf16.msra.mxu1 %v1111_v8  ;;  %v1224_v8 = vld [vmem:[#allocation2 + $0x398] sm:$0xff] }
 0x3d6   :  { %1534 = vmatpush1.bf16.msra.mxu0 %v1113_v9  ;;  %1453 = vmatprep.subr.bf16.mxu1 %v1120_v11  ;;  %v1226_v9 = vld [vmem:[#allocation2 + $0x3a8] sm:$0xff]  ;;  %v1223_v11 = vld [vmem:[#allocation2 + $0x390] sm:$0xff] }
 0x3d7   :  { %1535 = vmatprep.subr.bf16.mxu0 %v1122_v2  ;;  %1483 = vmatprep.mubr.bf16.mxu1 %v2979_v50  ;;  %v1225_v2 = vld [vmem:[#allocation2 + $0x3a0] sm:$0xff] }
 0x3d8   :  { %1565 = vmatprep.mubr.bf16.mxu0 %v2979_v50 }
 0x3d9   :  { %1454 = vmatpush1.bf16.msra.mxu1 %v1119_v26  ;;  %v1232_v26 = vld [vmem:[#allocation2 + $0x3d8] sm:$0xff] }
 0x3da   :  { %1536 = vmatpush1.bf16.msra.mxu0 %v1121_v41  ;;  %1455 = vmatprep.subr.bf16.mxu1 %v1128_v46  ;;  %v1234_v41 = vld [vmem:[#allocation2 + $0x3e8] sm:$0xff]  ;;  %v1231_v46 = vld [vmem:[#allocation2 + $0x3d0] sm:$0xff] }
 0x3db   :  { %1537 = vmatprep.subr.bf16.mxu0 %v1130_v48  ;;  %v1233_v48 = vld [vmem:[#allocation2 + $0x3e0] sm:$0xff] }
 0x3dd   :  { %1456 = vmatpush1.bf16.msra.mxu1 %v1127_v12  ;;  %v1240_v12 = vld [vmem:[#allocation2 + $0x418] sm:$0xff] }
 0x3de   :  { %1538 = vmatpush1.bf16.msra.mxu0 %v1129_v13  ;;  %1457 = vmatprep.subr.bf16.mxu1 %v1136_v14  ;;  %v1242_v13 = vld [vmem:[#allocation2 + $0x428] sm:$0xff]  ;;  %v1239_v14 = vld [vmem:[#allocation2 + $0x410] sm:$0xff] }
 0x3df   :  { %1539 = vmatprep.subr.bf16.mxu0 %v1138_v17  ;;  %v1241_v17 = vld [vmem:[#allocation2 + $0x420] sm:$0xff] }
 0x3e1   :  { %1458 = vmatpush1.bf16.msra.mxu1 %v1135_v18  ;;  %v1248_v18 = vld [vmem:[#allocation2 + $0x458] sm:$0xff] }
 0x3e2   :  { %1540 = vmatpush1.bf16.msra.mxu0 %v1137_v19  ;;  %1459 = vmatprep.subr.bf16.mxu1 %v1144_v20  ;;  %v1250_v19 = vld [vmem:[#allocation2 + $0x468] sm:$0xff]  ;;  %v1247_v20 = vld [vmem:[#allocation2 + $0x450] sm:$0xff] }
 0x3e3   :  { %1541 = vmatprep.subr.bf16.mxu0 %v1146_v21  ;;  %v1249_v21 = vld [vmem:[#allocation2 + $0x460] sm:$0xff] }
 0x3e5   :  { %1460 = vmatpush1.bf16.msra.mxu1 %v1143_v22  ;;  %v1256_v22 = vld [vmem:[#allocation2 + $0x498] sm:$0xff] }
 0x3e6   :  { %1542 = vmatpush1.bf16.msra.mxu0 %v1145_v24  ;;  %1461 = vmatprep.subr.bf16.mxu1 %v1152_v25  ;;  %v1258_v24 = vld [vmem:[#allocation2 + $0x4a8] sm:$0xff]  ;;  %v1255_v25 = vld [vmem:[#allocation2 + $0x490] sm:$0xff] }
 0x3e7   :  { %1543 = vmatprep.subr.bf16.mxu0 %v1154_v27  ;;  %v1257_v27 = vld [vmem:[#allocation2 + $0x4a0] sm:$0xff] }
 0x3e9   :  { %1462 = vmatpush1.bf16.msra.mxu1 %v1151_v28  ;;  %v1264_v28 = vld [vmem:[#allocation2 + $0x4d8] sm:$0xff] }
 0x3ea   :  { %1544 = vmatpush1.bf16.msra.mxu0 %v1153_v29  ;;  %1463 = vmatprep.subr.bf16.mxu1 %v1160_v30  ;;  %v1266_v29 = vld [vmem:[#allocation2 + $0x4e8] sm:$0xff]  ;;  %v1263_v30 = vld [vmem:[#allocation2 + $0x4d0] sm:$0xff] }
 0x3eb   :  { %1545 = vmatprep.subr.bf16.mxu0 %v1162_v31  ;;  %v1265_v31 = vld [vmem:[#allocation2 + $0x4e0] sm:$0xff] }
 0x3ed   :  { %1464 = vmatpush1.bf16.msra.mxu1 %v1159_v32  ;;  %v1272_v32 = vld [vmem:[#allocation2 + $0x518] sm:$0xff] }
 0x3ee   :  { %1546 = vmatpush1.bf16.msra.mxu0 %v1161_v33  ;;  %1465 = vmatprep.subr.bf16.mxu1 %v1168_v34  ;;  %v1274_v33 = vld [vmem:[#allocation2 + $0x528] sm:$0xff]  ;;  %v1271_v34 = vld [vmem:[#allocation2 + $0x510] sm:$0xff] }
 0x3ef   :  { %1547 = vmatprep.subr.bf16.mxu0 %v1170_v35  ;;  %v1273_v35 = vld [vmem:[#allocation2 + $0x520] sm:$0xff] }
 0x3f1   :  { %1466 = vmatpush1.bf16.msra.mxu1 %v1167_v36  ;;  %v1280_v36 = vld [vmem:[#allocation2 + $0x558] sm:$0xff] }
 0x3f2   :  { %1548 = vmatpush1.bf16.msra.mxu0 %v1169_v37  ;;  %1467 = vmatprep.subr.bf16.mxu1 %v1176_v10  ;;  %v1282_v37 = vld [vmem:[#allocation2 + $0x568] sm:$0xff]  ;;  %v1279_v10 = vld [vmem:[#allocation2 + $0x550] sm:$0xff] }
 0x3f3   :  { %1549 = vmatprep.subr.bf16.mxu0 %v1178_v63  ;;  %v1281_v63 = vld [vmem:[#allocation2 + $0x560] sm:$0xff] }
 0x3f5   :  { %1468 = vmatpush1.bf16.msra.mxu1 %v1175_v38  ;;  %v1288_v38 = vld [vmem:[#allocation2 + $0x598] sm:$0xff] }
 0x3f6   :  { %1550 = vmatpush1.bf16.msra.mxu0 %v1177_v40  ;;  %1469 = vmatprep.subr.bf16.mxu1 %v1184_v44  ;;  %v1290_v40 = vld [vmem:[#allocation2 + $0x5a8] sm:$0xff]  ;;  %v1287_v44 = vld [vmem:[#allocation2 + $0x590] sm:$0xff] }
 0x3f7   :  { %1551 = vmatprep.subr.bf16.mxu0 %v1186_v23  ;;  %v1289_v23 = vld [vmem:[#allocation2 + $0x5a0] sm:$0xff] }
 0x3f9   :  { %1470 = vmatpush1.bf16.msra.mxu1 %v1183_v39  ;;  %v1296_v39 = vld [vmem:[#allocation2 + $0x5d8] sm:$0xff] }
 0x3fa   :  { %1552 = vmatpush1.bf16.msra.mxu0 %v1185_v42  ;;  %1471 = vmatprep.subr.bf16.mxu1 %v1192_v47  ;;  %v1298_v42 = vld [vmem:[#allocation2 + $0x5e8] sm:$0xff]  ;;  %v1295_v47 = vld [vmem:[#allocation2 + $0x5d0] sm:$0xff] }
 0x3fb   :  { %1553 = vmatprep.subr.bf16.mxu0 %v1194_v49  ;;  %v1297_v49 = vld [vmem:[#allocation2 + $0x5e0] sm:$0xff] }
 0x3fd   :  { %1472 = vmatpush1.bf16.msra.mxu1 %v1191_v54  ;;  %v1304_v54 = vld [vmem:[#allocation2 + $0x618] sm:$0xff] }
 0x3fe   :  { %1554 = vmatpush1.bf16.msra.mxu0 %v1193_v55  ;;  %1473 = vmatprep.subr.bf16.mxu1 %v1200_v56  ;;  %v1306_v55 = vld [vmem:[#allocation2 + $0x628] sm:$0xff]  ;;  %v1303_v56 = vld [vmem:[#allocation2 + $0x610] sm:$0xff] }
 0x3ff   :  { %1555 = vmatprep.subr.bf16.mxu0 %v1202_v57  ;;  %v1305_v57 = vld [vmem:[#allocation2 + $0x620] sm:$0xff] }
 0x401   :  { %1474 = vmatpush1.bf16.msra.mxu1 %v1199_v58  ;;  %v1312_v58 = vld [vmem:[#allocation2 + $0x658] sm:$0xff] }
 0x402   :  { %1556 = vmatpush1.bf16.msra.mxu0 %v1201_v59  ;;  %1475 = vmatprep.subr.bf16.mxu1 %v1208_v60  ;;  %v1314_v59 = vld [vmem:[#allocation2 + $0x668] sm:$0xff]  ;;  %v1311_v60 = vld [vmem:[#allocation2 + $0x650] sm:$0xff] }
 0x403   :  { %1557 = vmatprep.subr.bf16.mxu0 %v1210_v61  ;;  %v1313_v61 = vld [vmem:[#allocation2 + $0x660] sm:$0xff] }
 0x405   :  { %1476 = vmatpush1.bf16.msra.mxu1 %v1207_v62  ;;  %v1320_v62 = vld [vmem:[#allocation2 + $0x698] sm:$0xff] }
 0x406   :  { %1558 = vmatpush1.bf16.msra.mxu0 %v1209_v0  ;;  %1477 = vmatprep.subr.bf16.mxu1 %v1216_v1  ;;  %v1322_v0 = vld [vmem:[#allocation2 + $0x6a8] sm:$0xff]  ;;  %v1319_v1 = vld [vmem:[#allocation2 + $0x690] sm:$0xff] }
 0x407   :  { %1559 = vmatprep.subr.bf16.mxu0 %v1218_v3  ;;  %v1321_v3 = vld [vmem:[#allocation2 + $0x6a0] sm:$0xff] }
 0x409   :  { %1478 = vmatpush1.bf16.msra.mxu1 %v1215_v4  ;;  %v1328_v4 = vld [vmem:[#allocation2 + $0x6d8] sm:$0xff] }
 0x40a   :  { %1560 = vmatpush1.bf16.msra.mxu0 %v1217_v5  ;;  %1479 = vmatprep.subr.bf16.mxu1 %v1224_v8  ;;  %v1330_v5 = vld [vmem:[#allocation2 + $0x6e8] sm:$0xff]  ;;  %v1327_v8 = vld [vmem:[#allocation2 + $0x6d0] sm:$0xff] }
 0x40b   :  { %1561 = vmatprep.subr.bf16.mxu0 %v1226_v9  ;;  %v1329_v9 = vld [vmem:[#allocation2 + $0x6e0] sm:$0xff] }
 0x40d   :  { %1480 = vmatpush1.bf16.msra.mxu1 %v1223_v11  ;;  %v1336_v11 = vld [vmem:[#allocation2 + $0x718] sm:$0xff] }
 0x40e   :  { %1562 = vmatpush1.bf16.msra.mxu0 %v1225_v2  ;;  %1481 = vmatprep.subr.bf16.mxu1 %v1232_v26  ;;  %v1338_v2 = vld [vmem:[#allocation2 + $0x728] sm:$0xff]  ;;  %v1335_v26 = vld [vmem:[#allocation2 + $0x710] sm:$0xff] }
 0x40f   :  { %1563 = vmatprep.subr.bf16.mxu0 %v1234_v41  ;;  %v1337_v41 = vld [vmem:[#allocation2 + $0x720] sm:$0xff] }
 0x411   :  { %1482 = vmatpush1.bf16.msra.mxu1 %v1231_v46  ;;  %v1344_v46 = vld [vmem:[#allocation2 + $0x758] sm:$0xff] }
 0x412   :  { %1564 = vmatpush1.bf16.msra.mxu0 %v1233_v48  ;;  %1492 = vmatprep.subr.bf16.mxu1 %v1240_v12  ;;  %v1346_v48 = vld [vmem:[#allocation2 + $0x768] sm:$0xff]  ;;  %v1343_v12 = vld [vmem:[#allocation2 + $0x750] sm:$0xff] }
 0x413   :  { %1574 = vmatprep.subr.bf16.mxu0 %v1242_v13  ;;  %v1345_v13 = vld [vmem:[#allocation2 + $0x760] sm:$0xff] }
 0x414   :  { %1484 = vmatmul.mubr.bf16.vlgmr.msra.gmra.mrb[16].mxu1 %v2988_v6 }
 0x415   :  { %1566 = vmatmul.mubr.bf16.vlgmr.msra.gmra.mrb[8].mxu0 %v2988_v6  ;;  %1493 = vmatpush1.bf16.msra.mxu1 %v1239_v14  ;;  %v1352_v14 = vld [vmem:[#allocation2 + $0x798] sm:$0xff] }
 0x416   :  { %1575 = vmatpush1.bf16.msra.mxu0 %v1241_v17  ;;  %1494 = vmatprep.subr.bf16.mxu1 %v1248_v18  ;;  %v1354_v17 = vld [vmem:[#allocation2 + $0x7a8] sm:$0xff]  ;;  %v1351_v18 = vld [vmem:[#allocation2 + $0x790] sm:$0xff] }
 0x417   :  { %1576 = vmatprep.subr.bf16.mxu0 %v1250_v19  ;;  %1524 = vmatprep.mubr.bf16.mxu1 %v2981_v53  ;;  %v1353_v19 = vld [vmem:[#allocation2 + $0x7a0] sm:$0xff] }
 0x418   :  { %1606 = vmatprep.mubr.bf16.mxu0 %v2981_v53 }
 0x419   :  { %1495 = vmatpush1.bf16.msra.mxu1 %v1247_v20  ;;  %v1360_v20 = vld [vmem:[#allocation2 + $0x7d8] sm:$0xff] }
 0x41a   :  { %1577 = vmatpush1.bf16.msra.mxu0 %v1249_v21  ;;  %1496 = vmatprep.subr.bf16.mxu1 %v1256_v22  ;;  %v1362_v21 = vld [vmem:[#allocation2 + $0x7e8] sm:$0xff]  ;;  %v1359_v22 = vld [vmem:[#allocation2 + $0x7d0] sm:$0xff] }
 0x41b   :  { %1578 = vmatprep.subr.bf16.mxu0 %v1258_v24  ;;  %v1361_v24 = vld [vmem:[#allocation2 + $0x7e0] sm:$0xff] }
 0x41d   :  { %1497 = vmatpush1.bf16.msra.mxu1 %v1255_v25  ;;  %v1116_v25 = vld [vmem:[#allocation2 + $0x38] sm:$0xff] }
 0x41e   :  { %1579 = vmatpush1.bf16.msra.mxu0 %v1257_v27  ;;  %1498 = vmatprep.subr.bf16.mxu1 %v1264_v28  ;;  %v1115_v27 = vld [vmem:[#allocation2 + $0x30] sm:$0xff]  ;;  %v1124_v28 = vld [vmem:[#allocation2 + $0x78] sm:$0xff] }
 0x41f   :  { %1580 = vmatprep.subr.bf16.mxu0 %v1266_v29  ;;  %v1123_v29 = vld [vmem:[#allocation2 + $0x70] sm:$0xff] }
 0x421   :  { %1499 = vmatpush1.bf16.msra.mxu1 %v1263_v30  ;;  %v1132_v30 = vld [vmem:[#allocation2 + $0xb8] sm:$0xff] }
 0x422   :  { %1581 = vmatpush1.bf16.msra.mxu0 %v1265_v31  ;;  %1500 = vmatprep.subr.bf16.mxu1 %v1272_v32  ;;  %v1131_v31 = vld [vmem:[#allocation2 + $0xb0] sm:$0xff]  ;;  %v1140_v32 = vld [vmem:[#allocation2 + $0xf8] sm:$0xff] }
 0x423   :  { %1582 = vmatprep.subr.bf16.mxu0 %v1274_v33  ;;  %v1139_v33 = vld [vmem:[#allocation2 + $0xf0] sm:$0xff] }
 0x425   :  { %1501 = vmatpush1.bf16.msra.mxu1 %v1271_v34  ;;  %v1148_v34 = vld [vmem:[#allocation2 + $0x138] sm:$0xff] }
 0x426   :  { %1583 = vmatpush1.bf16.msra.mxu0 %v1273_v35  ;;  %1502 = vmatprep.subr.bf16.mxu1 %v1280_v36  ;;  %v1147_v35 = vld [vmem:[#allocation2 + $0x130] sm:$0xff]  ;;  %v1156_v36 = vld [vmem:[#allocation2 + $0x178] sm:$0xff] }
 0x427   :  { %1584 = vmatprep.subr.bf16.mxu0 %v1282_v37  ;;  %v1155_v37 = vld [vmem:[#allocation2 + $0x170] sm:$0xff] }
 0x429   :  { %1503 = vmatpush1.bf16.msra.mxu1 %v1279_v10  ;;  %v1164_v10 = vld [vmem:[#allocation2 + $0x1b8] sm:$0xff] }
 0x42a   :  { %1585 = vmatpush1.bf16.msra.mxu0 %v1281_v63  ;;  %1504 = vmatprep.subr.bf16.mxu1 %v1288_v38  ;;  %v1172_v63 = vld [vmem:[#allocation2 + $0x1f8] sm:$0xff]  ;;  %v1171_v38 = vld [vmem:[#allocation2 + $0x1f0] sm:$0xff] }
 0x42b   :  { %1586 = vmatprep.subr.bf16.mxu0 %v1290_v40  ;;  %v1180_v40 = vld [vmem:[#allocation2 + $0x238] sm:$0xff] }
 0x42d   :  { %1505 = vmatpush1.bf16.msra.mxu1 %v1287_v44  ;;  %v1179_v44 = vld [vmem:[#allocation2 + $0x230] sm:$0xff] }
 0x42e   :  { %1587 = vmatpush1.bf16.msra.mxu0 %v1289_v23  ;;  %1506 = vmatprep.subr.bf16.mxu1 %v1296_v39  ;;  %v1188_v23 = vld [vmem:[#allocation2 + $0x278] sm:$0xff]  ;;  %v1187_v39 = vld [vmem:[#allocation2 + $0x270] sm:$0xff] }
 0x42f   :  { %1588 = vmatprep.subr.bf16.mxu0 %v1298_v42  ;;  %v1196_v42 = vld [vmem:[#allocation2 + $0x2b8] sm:$0xff] }
 0x431   :  { %1507 = vmatpush1.bf16.msra.mxu1 %v1295_v47  ;;  %v1195_v47 = vld [vmem:[#allocation2 + $0x2b0] sm:$0xff] }
 0x432   :  { %1589 = vmatpush1.bf16.msra.mxu0 %v1297_v49  ;;  %1508 = vmatprep.subr.bf16.mxu1 %v1304_v54  ;;  %v1204_v49 = vld [vmem:[#allocation2 + $0x2f8] sm:$0xff]  ;;  %v1203_v54 = vld [vmem:[#allocation2 + $0x2f0] sm:$0xff] }
 0x433   :  { %1590 = vmatprep.subr.bf16.mxu0 %v1306_v55  ;;  %v1212_v55 = vld [vmem:[#allocation2 + $0x338] sm:$0xff] }
 0x435   :  { %1509 = vmatpush1.bf16.msra.mxu1 %v1303_v56  ;;  %v1211_v56 = vld [vmem:[#allocation2 + $0x330] sm:$0xff] }
 0x436   :  { %1591 = vmatpush1.bf16.msra.mxu0 %v1305_v57  ;;  %1510 = vmatprep.subr.bf16.mxu1 %v1312_v58  ;;  %v1220_v57 = vld [vmem:[#allocation2 + $0x378] sm:$0xff]  ;;  %v1219_v58 = vld [vmem:[#allocation2 + $0x370] sm:$0xff] }
 0x437   :  { %1592 = vmatprep.subr.bf16.mxu0 %v1314_v59  ;;  %v1228_v59 = vld [vmem:[#allocation2 + $0x3b8] sm:$0xff] }
 0x439   :  { %1511 = vmatpush1.bf16.msra.mxu1 %v1311_v60  ;;  %v1227_v60 = vld [vmem:[#allocation2 + $0x3b0] sm:$0xff] }
 0x43a   :  { %1593 = vmatpush1.bf16.msra.mxu0 %v1313_v61  ;;  %1512 = vmatprep.subr.bf16.mxu1 %v1320_v62  ;;  %v1236_v61 = vld [vmem:[#allocation2 + $0x3f8] sm:$0xff]  ;;  %v1235_v62 = vld [vmem:[#allocation2 + $0x3f0] sm:$0xff] }
 0x43b   :  { %1594 = vmatprep.subr.bf16.mxu0 %v1322_v0  ;;  %v1244_v0 = vld [vmem:[#allocation2 + $0x438] sm:$0xff] }
 0x43d   :  { %1513 = vmatpush1.bf16.msra.mxu1 %v1319_v1  ;;  %v1243_v1 = vld [vmem:[#allocation2 + $0x430] sm:$0xff] }
 0x43e   :  { %1595 = vmatpush1.bf16.msra.mxu0 %v1321_v3  ;;  %1514 = vmatprep.subr.bf16.mxu1 %v1328_v4  ;;  %v1252_v3 = vld [vmem:[#allocation2 + $0x478] sm:$0xff]  ;;  %v1251_v4 = vld [vmem:[#allocation2 + $0x470] sm:$0xff] }
 0x43f   :  { %1596 = vmatprep.subr.bf16.mxu0 %v1330_v5  ;;  %v1260_v5 = vld [vmem:[#allocation2 + $0x4b8] sm:$0xff] }
 0x441   :  { %1515 = vmatpush1.bf16.msra.mxu1 %v1327_v8  ;;  %v1259_v8 = vld [vmem:[#allocation2 + $0x4b0] sm:$0xff] }
 0x442   :  { %1597 = vmatpush1.bf16.msra.mxu0 %v1329_v9  ;;  %1516 = vmatprep.subr.bf16.mxu1 %v1336_v11  ;;  %v1268_v9 = vld [vmem:[#allocation2 + $0x4f8] sm:$0xff]  ;;  %v1267_v11 = vld [vmem:[#allocation2 + $0x4f0] sm:$0xff] }
 0x443   :  { %1598 = vmatprep.subr.bf16.mxu0 %v1338_v2  ;;  %v1276_v2 = vld [vmem:[#allocation2 + $0x538] sm:$0xff] }
 0x445   :  { %1517 = vmatpush1.bf16.msra.mxu1 %v1335_v26  ;;  %v1275_v26 = vld [vmem:[#allocation2 + $0x530] sm:$0xff] }
 0x446   :  { %1599 = vmatpush1.bf16.msra.mxu0 %v1337_v41  ;;  %1518 = vmatprep.subr.bf16.mxu1 %v1344_v46  ;;  %v1284_v41 = vld [vmem:[#allocation2 + $0x578] sm:$0xff] }
 0x447   :  { %1600 = vmatprep.subr.bf16.mxu0 %v1346_v48  ;;  %v1292_v48 = vld [vmem:[#allocation2 + $0x5b8] sm:$0xff] }
 0x449   :  { %1519 = vmatpush1.bf16.msra.mxu1 %v1343_v12 }
 0x44a   :  { %1601 = vmatpush1.bf16.msra.mxu0 %v1345_v13  ;;  %1520 = vmatprep.subr.bf16.mxu1 %v1352_v14 }
 0x44b   :  { %1602 = vmatprep.subr.bf16.mxu0 %v1354_v17 }
 0x44d   :  { %1521 = vmatpush1.bf16.msra.mxu1 %v1351_v18 }
 0x44e   :  { %1603 = vmatpush1.bf16.msra.mxu0 %v1353_v19  ;;  %1522 = vmatprep.subr.bf16.mxu1 %v1360_v20 }
 0x44f   :  { %1604 = vmatprep.subr.bf16.mxu0 %v1362_v21 }
 0x451   :  { %1523 = vmatpush1.bf16.msra.mxu1 %v1359_v22 }
 0x452   :  { %1605 = vmatpush1.bf16.msra.mxu0 %v1361_v24  ;;  %1615 = vmatprep.subr.bf16.mxu1 %v1116_v25  ;;  %v1291_v24 = vld [vmem:[#allocation2 + $0x5b0] sm:$0xff] }
 0x454   :  { %1525 = vmatmul.mubr.bf16.vlgmr.msra.gmra.mrb[16].mxu1 %v2993_v7 }
 0x455   :  { %1607 = vmatmul.mubr.bf16.vlgmr.msra.gmra.mrb[8].mxu0 %v2993_v7  ;;  %1616 = vmatpush1.bf16.msra.mxu1 %v1115_v27 }
 0x456   :  { %1647 = vmatprep.mubr.bf16.mxu1 %v2979_v50  ;;  %1617 = vmatprep.subr.bf16.mxu1 %v1124_v28  ;;  %v1163_v50 = vld [vmem:[#allocation2 + $0x1b0] sm:$0xff] }
 0x459   :  { %1618 = vmatpush1.bf16.msra.mxu1 %v1123_v29  ;;  %v1300_v29 = vld [vmem:[#allocation2 + $0x5f8] sm:$0xff] }
 0x45a   :  { %1619 = vmatprep.subr.bf16.mxu1 %v1132_v30 }
 0x45d   :  { %1620 = vmatpush1.bf16.msra.mxu1 %v1131_v31 }
 0x45e   :  { %1621 = vmatprep.subr.bf16.mxu1 %v1140_v32 }
 0x461   :  { %1622 = vmatpush1.bf16.msra.mxu1 %v1139_v33 }
 0x462   :  { %1623 = vmatprep.subr.bf16.mxu1 %v1148_v34 }
 0x465   :  { %1624 = vmatpush1.bf16.msra.mxu1 %v1147_v35 }
 0x466   :  { %1625 = vmatprep.subr.bf16.mxu1 %v1156_v36  ;;  %v1299_v36 = vld [vmem:[#allocation2 + $0x5f0] sm:$0xff] }
 0x469   :  { %1626 = vmatpush1.bf16.msra.mxu1 %v1155_v37 }
 0x46a   :  { %1627 = vmatprep.subr.bf16.mxu1 %v1164_v10 }
 0x46d   :  { %1628 = vmatpush1.bf16.msra.mxu1 %v1163_v50  ;;  %v1308_v50 = vld [vmem:[#allocation2 + $0x638] sm:$0xff] }
 0x46e   :  { %1629 = vmatprep.subr.bf16.mxu1 %v1172_v63 }
 0x471   :  { %1630 = vmatpush1.bf16.msra.mxu1 %v1171_v38 }
 0x472   :  { %1631 = vmatprep.subr.bf16.mxu1 %v1180_v40 }
 0x475   :  { %1632 = vmatpush1.bf16.msra.mxu1 %v1179_v44 }
 0x476   :  { %1633 = vmatprep.subr.bf16.mxu1 %v1188_v23 }
 0x479   :  { %1634 = vmatpush1.bf16.msra.mxu1 %v1187_v39 }
 0x47a   :  { %1635 = vmatprep.subr.bf16.mxu1 %v1196_v42  ;;  %v1307_v42 = vld [vmem:[#allocation2 + $0x630] sm:$0xff] }
 0x47d   :  { %1636 = vmatpush1.bf16.msra.mxu1 %v1195_v47 }
 0x47e   :  { %1637 = vmatprep.subr.bf16.mxu1 %v1204_v49 }
 0x481   :  { %1638 = vmatpush1.bf16.msra.mxu1 %v1203_v54  ;;  %v1316_v54 = vld [vmem:[#allocation2 + $0x678] sm:$0xff] }
 0x482   :  { %1639 = vmatprep.subr.bf16.mxu1 %v1212_v55 }
 0x485   :  { %1640 = vmatpush1.bf16.msra.mxu1 %v1211_v56 }
 0x486   :  { %1641 = vmatprep.subr.bf16.mxu1 %v1220_v57 }
 0x489   :  { %1642 = vmatpush1.bf16.msra.mxu1 %v1219_v58 }
 0x48a   :  { %1643 = vmatprep.subr.bf16.mxu1 %v1228_v59 }
 0x48d   :  { %1644 = vmatpush1.bf16.msra.mxu1 %v1227_v60 }
 0x48e   :  { %1645 = vmatprep.subr.bf16.mxu1 %v1236_v61  ;;  %v1315_v61 = vld [vmem:[#allocation2 + $0x670] sm:$0xff] }
 0x491   :  { %1646 = vmatpush1.bf16.msra.mxu1 %v1235_v62 }
 0x492   :  { %1656 = vmatprep.subr.bf16.mxu1 %v1244_v0 }
 0x494   :  { %1648 = vmatmul.mubr.bf16.vlgmr.msra.gmra.mrb[20].mxu1 %v2988_v6  ;;  %v1283_v6 = vld [vmem:[#allocation2 + $0x570] sm:$0xff] }
 0x495   :  { %1657 = vmatpush1.bf16.msra.mxu1 %v1243_v1  ;;  %1688 = vmatprep.mubr.bf16.mxu1 %v2981_v53  ;;  %v1324_v1 = vld [vmem:[#allocation2 + $0x6b8] sm:$0xff] }
 0x496   :  { %1658 = vmatprep.subr.bf16.mxu1 %v1252_v3 }
 0x499   :  { %1659 = vmatpush1.bf16.msra.mxu1 %v1251_v4 }
 0x49a   :  { %1660 = vmatprep.subr.bf16.mxu1 %v1260_v5 }
 0x49d   :  { %1661 = vmatpush1.bf16.msra.mxu1 %v1259_v8 }
 0x49e   :  { %1662 = vmatprep.subr.bf16.mxu1 %v1268_v9 }
 0x4a1   :  { %1663 = vmatpush1.bf16.msra.mxu1 %v1267_v11  ;;  %v1323_v11 = vld [vmem:[#allocation2 + $0x6b0] sm:$0xff] }
 0x4a2   :  { %1664 = vmatprep.subr.bf16.mxu1 %v1276_v2 }
 0x4a5   :  { %1665 = vmatpush1.bf16.msra.mxu1 %v1275_v26  ;;  %v1332_v26 = vld [vmem:[#allocation2 + $0x6f8] sm:$0xff] }
 0x4a6   :  { %1666 = vmatprep.subr.bf16.mxu1 %v1284_v41 }
 0x4a7   :  { %v1403_v46 = vpop.f32.mrb[12].mxu1 }
 0x4a8   :  { %v1444_v53 = vpop.f32.mrb[4].mxu0  ;;  %v1405_v13 = vpop.f32.mrb[13].mxu1 }
 0x4a9   :  { %v3008_v12 = vadd.f32 %v1444_v53, %v1403_v46  ;;  %v1446_v14 = vpop.f32.mrb[5].mxu0  ;;  %v1407_v18 = vpop.f32.mrb[14].mxu1  ;;  %1667 = vmatpush1.bf16.msra.mxu1 %v1283_v6  ;;  %v1331_v46 = vld [vmem:[#allocation2 + $0x6f0] sm:$0xff]  ;;  %v1340_v53 = vld [vmem:[#allocation2 + $0x738] sm:$0xff] }
 0x4aa   :  { %v3010_v17 = vadd.f32 %v1446_v14, %v1405_v13  ;;  %v1448_v19 = vpop.f32.mrb[6].mxu0  ;;  %v1408_v22 = vpop.f32.mrb[15].mxu1  ;;  %1668 = vmatprep.subr.bf16.mxu1 %v1292_v48  ;;  %v1339_v48 = vld [vmem:[#allocation2 + $0x730] sm:$0xff]  ;;  %v1348_v13 = vld [vmem:[#allocation2 + $0x778] sm:$0xff] }
 0x4ab   :  { %v1699_v20 = vrot.slane %v3008_v12, 4  ;;  %v1755_v21 = vmul.f32 %v3008_v12, %v3008_v12  ;;  %v1449_v25 = vpop.f32.mrb[7].mxu0  ;;  %v1347_v14 = vld [vmem:[#allocation2 + $0x770] sm:$0xff]  ;;  %v1356_v18 = vld [vmem:[#allocation2 + $0x7b8] sm:$0xff] }
 0x4ac   :  { %v1705_v27 = vrot.slane %v3010_v17, 4  ;;  %v1756_v28 = vmul.f32 %v3010_v17, %v3010_v17  ;;  %v1355_v22 = vld [vmem:[#allocation2 + $0x7b0] sm:$0xff] }
 0x4ad   :  { %v1700_v30 = vadd.f32 %v1699_v20, %v3008_v12  ;;  %v1763_v31 = vrot.slane %v1755_v21, 4  ;;  %1669 = vmatpush1.bf16.msra.mxu1 %v1291_v24  ;;  %v1364_v24 = vld [vmem:[#allocation2 + $0x7f8] sm:$0xff]  ;;  %v1363_v25 = vld [vmem:[#allocation2 + $0x7f0] sm:$0xff] }
 0x4ae   :  { %v1706_v32 = vadd.f32 %v1705_v27, %v3010_v17  ;;  %v1769_v33 = vrot.slane %v1756_v28, 4  ;;  %1670 = vmatprep.subr.bf16.mxu1 %v1300_v29 }
 0x4af   :  { %v1701_v34 = vrot.slane %v1700_v30, 2  ;;  %v1764_v35 = vadd.f32 %v1763_v31, %v1755_v21 }
 0x4b0   :  { %v1707_v37 = vrot.slane %v1706_v32, 2  ;;  %v1770_v10 = vadd.f32 %v1769_v33, %v1756_v28 }
 0x4b1   :  { %v1702_v63 = vadd.f32 %v1701_v34, %v1700_v30  ;;  %v1765_v38 = vrot.slane %v1764_v35, 2  ;;  %1671 = vmatpush1.bf16.msra.mxu1 %v1299_v36 }
 0x4b2   :  { %v1708_v40 = vadd.f32 %v1707_v37, %v1706_v32  ;;  %v1771_v44 = vrot.slane %v1770_v10, 2  ;;  %1672 = vmatprep.subr.bf16.mxu1 %v1308_v50 }
 0x4b3   :  { %v1703_v23 = vrot.slane %v1702_v63, 1  ;;  %v1766_v39 = vadd.f32 %v1765_v38, %v1764_v35 }
 0x4b4   :  { %v1709_v47 = vrot.slane %v1708_v40, 1  ;;  %v1772_v49 = vadd.f32 %v1771_v44, %v1770_v10 }
 0x4b5   :  { %v1704_v55 = vadd.f32 %v1703_v23, %v1702_v63  ;;  %v1767_v56 = vrot.slane %v1766_v39, 1  ;;  %1673 = vmatpush1.bf16.msra.mxu1 %v1307_v42 }
 0x4b6   :  { %v1710_v57 = vadd.f32 %v1709_v47, %v1708_v40  ;;  %v1773_v58 = vrot.slane %v1772_v49, 1  ;;  %1674 = vmatprep.subr.bf16.mxu1 %v1316_v54 }
 0x4b7   :  { %v3020_v59 = vmul.f32 0.125, %v1704_v55  ;;  %v1768_v60 = vadd.f32 %v1767_v56, %v1766_v39 }
 0x4b8   :  { %v3022_v62 = vmul.f32 0.125, %v1710_v57  ;;  %v1774_v0 = vadd.f32 %v1773_v58, %v1772_v49 }
 0x4b9   :  { %v1811_v3 = vmul.f32 0.125, %v1768_v60  ;;  %v1819_v4 = vmul.f32 %v3020_v59, %v3020_v59  ;;  %1675 = vmatpush1.bf16.msra.mxu1 %v1315_v61 }
 0x4ba   :  { %v1812_v5 = vmul.f32 0.125, %v1774_v0  ;;  %v1820_v8 = vmul.f32 %v3022_v62, %v3022_v62  ;;  %1676 = vmatprep.subr.bf16.mxu1 %v1324_v1 }
 0x4bb   :  { %v1827_v9 = vsub.f32 %v1811_v3, %v1819_v4 }
 0x4bc   :  { %v1828_v2 = vsub.f32 %v1812_v5, %v1820_v8 }
 0x4bd   :  { %v1835_v41 = vadd.f32 1e-05, %v1827_v9  ;;  %1677 = vmatpush1.bf16.msra.mxu1 %v1323_v11 }
 0x4be   :  { %v1836_v6 = vadd.f32 1e-05, %v1828_v2  ;;  %1678 = vmatprep.subr.bf16.mxu1 %v1332_v26 }
 0x4bf   :  { %2707 = vrsqrt.f32 %v1835_v41 }
 0x4c0   :  { %2709 = vrsqrt.f32 %v1836_v6 }
 0x4c1   :  { %1679 = vmatpush1.bf16.msra.mxu1 %v1331_v46 }
 0x4c2   :  { %1680 = vmatprep.subr.bf16.mxu1 %v1340_v53 }
 0x4c5   :  { %1681 = vmatpush1.bf16.msra.mxu1 %v1339_v48 }
 0x4c6   :  { %1682 = vmatprep.subr.bf16.mxu1 %v1348_v13 }
 0x4c9   :  { %v3028_v19 = vpop.eup %2707  ;;  %1683 = vmatpush1.bf16.msra.mxu1 %v1347_v14 }
 0x4ca   :  { %v3030_v20 = vpop.eup %2709  ;;  %1684 = vmatprep.subr.bf16.mxu1 %v1356_v18 }
 0x4cb   :  { %v1859_v21 = vcombine.low %v3028_v19, %v3030_v20 }
 0x4cd   :  { %1685 = vmatpush1.bf16.msra.mxu1 %v1355_v22 }
 0x4ce   :  { %1686 = vmatprep.subr.bf16.mxu1 %v1364_v24 }
 0x4d1   :  { %1687 = vmatpush1.bf16.msra.mxu1 %v1363_v25 }
 0x4d4   :  { %1689 = vmatmul.mubr.bf16.vlgmr.msra.gmra.mrb[20].mxu1 %v2993_v7 }
 0x527   :  { %v3035_v27 = vpop.f32.mrb[16].mxu1 }
 0x528   :  { %v3037_v28 = vpop.f32.mrb[8].mxu0  ;;  %v1711_v29 = vrot.slane %v3035_v27, 4  ;;  %v1757_v30 = vmul.f32 %v3035_v27, %v3035_v27  ;;  %v3042_v31 = vpop.f32.mrb[17].mxu1 }
 0x529   :  { %v1723_v32 = vrot.slane %v3037_v28, 4  ;;  %v1759_v33 = vmul.f32 %v3037_v28, %v3037_v28  ;;  %v3047_v34 = vpop.f32.mrb[9].mxu0  ;;  %v1717_v7 = vrot.slane %v3042_v31, 4  ;;  %v1758_v35 = vmul.f32 %v3042_v31, %v3042_v31  ;;  %v1530_v36 = vpop.f32.mrb[18].mxu1 }
 0x52a   :  { %v1729_v37 = vrot.slane %v3047_v34, 4  ;;  %v1760_v10 = vmul.f32 %v3047_v34, %v3047_v34  ;;  %v1612_v50 = vpop.f32.mrb[10].mxu0  ;;  %v1712_v63 = vadd.f32 %v1711_v29, %v3035_v27  ;;  %v1775_v38 = vrot.slane %v1757_v30, 4  ;;  %v1531_v40 = vpop.f32.mrb[19].mxu1 }
 0x52b   :  { %v1724_v44 = vadd.f32 %v1723_v32, %v3037_v28  ;;  %v1787_v23 = vrot.slane %v1759_v33, 4  ;;  %v1613_v39 = vpop.f32.mrb[11].mxu0  ;;  %v1718_v42 = vadd.f32 %v1717_v7, %v3042_v31  ;;  %v1781_v47 = vrot.slane %v1758_v35, 4 }
 0x52c   :  { %v1730_v49 = vadd.f32 %v1729_v37, %v3047_v34  ;;  %v1793_v54 = vrot.slane %v1760_v10, 4  ;;  %v1713_v55 = vrot.slane %v1712_v63, 2  ;;  %v1776_v56 = vadd.f32 %v1775_v38, %v1757_v30 }
 0x52d   :  { %v1725_v57 = vrot.slane %v1724_v44, 2  ;;  %v1788_v58 = vadd.f32 %v1787_v23, %v1759_v33  ;;  %v1719_v60 = vrot.slane %v1718_v42, 2  ;;  %v1782_v61 = vadd.f32 %v1781_v47, %v1758_v35 }
 0x52e   :  { %v1731_v0 = vrot.slane %v1730_v49, 2  ;;  %v1794_v1 = vadd.f32 %v1793_v54, %v1760_v10  ;;  %v1714_v3 = vadd.f32 %v1713_v55, %v1712_v63  ;;  %v1777_v4 = vrot.slane %v1776_v56, 2 }
 0x52f   :  { %v1726_v5 = vadd.f32 %v1725_v57, %v1724_v44  ;;  %v1789_v8 = vrot.slane %v1788_v58, 2  ;;  %v1720_v9 = vadd.f32 %v1719_v60, %v1718_v42  ;;  %v1783_v11 = vrot.slane %v1782_v61, 2 }
 0x530   :  { %v1732_v2 = vadd.f32 %v1731_v0, %v1730_v49  ;;  %v1795_v26 = vrot.slane %v1794_v1, 2  ;;  %v1715_v41 = vrot.slane %v1714_v3, 1  ;;  %v1778_v6 = vadd.f32 %v1777_v4, %v1776_v56 }
 0x531   :  { %v1727_v46 = vrot.slane %v1726_v5, 1  ;;  %v1790_v53 = vadd.f32 %v1789_v8, %v1788_v58  ;;  %v1721_v48 = vrot.slane %v1720_v9, 1  ;;  %v1784_v13 = vadd.f32 %v1783_v11, %v1782_v61 }
 0x532   :  { %v1733_v14 = vrot.slane %v1732_v2, 1  ;;  %v1796_v18 = vadd.f32 %v1795_v26, %v1794_v1  ;;  %v1716_v22 = vadd.f32 %v1715_v41, %v1714_v3  ;;  %v1779_v24 = vrot.slane %v1778_v6, 1 }
 0x533   :  { %v1728_v25 = vadd.f32 %v1727_v46, %v1726_v5  ;;  %v1791_v29 = vrot.slane %v1790_v53, 1  ;;  %v1722_v30 = vadd.f32 %v1721_v48, %v1720_v9  ;;  %v1785_v32 = vrot.slane %v1784_v13, 1 }
 0x534   :  { %v1734_v33 = vadd.f32 %v1733_v14, %v1732_v2  ;;  %v1797_v7 = vrot.slane %v1796_v18, 1  ;;  %v3059_v35 = vmul.f32 0.125, %v1716_v22  ;;  %v1780_v36 = vadd.f32 %v1779_v24, %v1778_v6 }
 0x535   :  { %v3061_v37 = vmul.f32 0.125, %v1728_v25  ;;  %v1792_v10 = vadd.f32 %v1791_v29, %v1790_v53  ;;  %v3063_v50 = vmul.f32 0.125, %v1722_v30  ;;  %v1786_v63 = vadd.f32 %v1785_v32, %v1784_v13 }
 0x536   :  { %v3065_v38 = vmul.f32 0.125, %v1734_v33  ;;  %v1798_v40 = vadd.f32 %v1797_v7, %v1796_v18  ;;  %v1813_v44 = vmul.f32 0.125, %v1780_v36  ;;  %v1821_v23 = vmul.f32 %v3059_v35, %v3059_v35 }
 0x537   :  { %v1815_v39 = vmul.f32 0.125, %v1792_v10  ;;  %v1823_v42 = vmul.f32 %v3061_v37, %v3061_v37  ;;  %v1814_v47 = vmul.f32 0.125, %v1786_v63  ;;  %v1822_v49 = vmul.f32 %v3063_v50, %v3063_v50 }
 0x538   :  { %v1816_v54 = vmul.f32 0.125, %v1798_v40  ;;  %v1824_v55 = vmul.f32 %v3065_v38, %v3065_v38  ;;  %v1829_v56 = vsub.f32 %v1813_v44, %v1821_v23  ;;  %v1869_v2 = vrot.slane %v1859_v21, %v2902_v45 }
 0x539   :  { %v1831_v57 = vsub.f32 %v1815_v39, %v1823_v42  ;;  %v1830_v58 = vsub.f32 %v1814_v47, %v1822_v49 }
 0x53a   :  { %v1832_v60 = vsub.f32 %v1816_v54, %v1824_v55  ;;  %v1837_v61 = vadd.f32 1e-05, %v1829_v56 }
 0x53b   :  { %v1839_v0 = vadd.f32 1e-05, %v1831_v57  ;;  %v1838_v1 = vadd.f32 1e-05, %v1830_v58 }
 0x53c   :  { %v1840_v3 = vadd.f32 1e-05, %v1832_v60  ;;  %2711 = vrsqrt.f32 %v1837_v61 }
 0x53d   :  { %2713 = vrsqrt.f32 %v1838_v1 }
 0x53e   :  { %2715 = vrsqrt.f32 %v1839_v0 }
 0x53f   :  { %2717 = vrsqrt.f32 %v1840_v3 }
 0x546   :  { %v2712_v4 = vpop.eup %2711 }
 0x547   :  { %v2714_v5 = vpop.eup %2713 }
 0x548   :  { %v2716_v8 = vpop.eup %2715  ;;  %v1860_v9 = vcombine.low %v2712_v4, %v2714_v5 }
 0x549   :  { %v2718_v11 = vpop.eup %2717 }
 0x54a   :  { %v1876_v26 = vrot.slane %v1860_v9, %v2902_v45  ;;  %v1861_v41 = vcombine.low %v2716_v8, %v2718_v11 }
 0x54c   :  { %v1891_v6 = vcombine.low %v1869_v2, %v1876_v26  ;;  %v1883_v26 = vrot.slane %v1861_v41, %v2902_v45 }
 0x5a7   :  { %v3080_v46 = vpop.f32.mrb[20].mxu1 }
 0x5a8   :  { %v1735_v53 = vrot.slane %v3080_v46, 4  ;;  %v1761_v48 = vmul.f32 %v3080_v46, %v3080_v46  ;;  %v3085_v13 = vpop.f32.mrb[21].mxu1 }
 0x5a9   :  { %v1741_v14 = vrot.slane %v3085_v13, 4  ;;  %v1762_v18 = vmul.f32 %v3085_v13, %v3085_v13  ;;  %v1694_v19 = vpop.f32.mrb[22].mxu1 }
 0x5aa   :  { %v1736_v20 = vadd.f32 %v1735_v53, %v3080_v46  ;;  %v1799_v21 = vrot.slane %v1761_v48, 4  ;;  %v1695_v22 = vpop.f32.mrb[23].mxu1  ;;  %v1697_v19 = vld [vmem:[#allocation9 + $0xf] sm:$0xff] }
 0x5ab   :  { %v1742_v24 = vadd.f32 %v1741_v14, %v3085_v13  ;;  %v1805_v25 = vrot.slane %v1762_v18, 4  ;;  %v1899_v14 = vrot.slane %v1891_v6, %v2902_v45  ;;  %v1933_v22 = vsub.s32 5, %v2899_v43 }
 0x5ac   :  { %v1737_v29 = vrot.slane %v1736_v20, 2  ;;  %v1800_v30 = vadd.f32 %v1799_v21, %v1761_v48  ;;  %v1929_v21 = vsub.s32 4, %v2899_v43 }
 0x5ad   :  { %v1743_v32 = vrot.slane %v1742_v24, 2  ;;  %v1806_v33 = vadd.f32 %v1805_v25, %v1762_v18  ;;  %v1941_v25 = vsub.s32 7, %v2899_v43 }
 0x5ae   :  { %v1738_v7 = vadd.f32 %v1737_v29, %v1736_v20  ;;  %v1801_v36 = vrot.slane %v1800_v30, 2 }
 0x5af   :  { %v1744_v10 = vadd.f32 %v1743_v32, %v1742_v24  ;;  %v1807_v63 = vrot.slane %v1806_v33, 2  ;;  %v1937_v24 = vsub.s32 6, %v2899_v43 }
 0x5b0   :  { %v1739_v40 = vrot.slane %v1738_v7, 1  ;;  %v1802_v44 = vadd.f32 %v1801_v36, %v1800_v30 }
 0x5b1   :  { %v1745_v23 = vrot.slane %v1744_v10, 1  ;;  %v1808_v39 = vadd.f32 %v1807_v63, %v1806_v33 }
 0x5b2   :  { %v1740_v42 = vadd.f32 %v1739_v40, %v1738_v7  ;;  %v1803_v47 = vrot.slane %v1802_v44, 1 }
 0x5b3   :  { %v1746_v49 = vadd.f32 %v1745_v23, %v1744_v10  ;;  %v1809_v54 = vrot.slane %v1808_v39, 1 }
 0x5b4   :  { %v1753_v55 = vmul.f32 0.125, %v1740_v42  ;;  %v1804_v56 = vadd.f32 %v1803_v47, %v1802_v44 }
 0x5b5   :  { %v1754_v57 = vmul.f32 0.125, %v1746_v49  ;;  %v1810_v58 = vadd.f32 %v1809_v54, %v1808_v39 }
 0x5b6   :  { %v1817_v60 = vmul.f32 0.125, %v1804_v56  ;;  %v1825_v61 = vmul.f32 %v1753_v55, %v1753_v55 }
 0x5b7   :  { %v1818_v0 = vmul.f32 0.125, %v1810_v58  ;;  %v1826_v1 = vmul.f32 %v1754_v57, %v1754_v57 }
 0x5b8   :  { %v1833_v3 = vsub.f32 %v1817_v60, %v1825_v61 }
 0x5b9   :  { %v1834_v4 = vsub.f32 %v1818_v0, %v1826_v1 }
 0x5ba   :  { %v1841_v5 = vadd.f32 1e-05, %v1833_v3  ;;  %v1698_v3 = vld [vmem:[#allocation9 + $0x17] sm:$0xff] }
 0x5bb   :  { %v1842_v8 = vadd.f32 1e-05, %v1834_v4 }
 0x5bc   :  { %2719 = vrsqrt.f32 %v1841_v5 }
 0x5bd   :  { %2721 = vrsqrt.f32 %v1842_v8 }
 0x5c6   :  { %v2720_v9 = vpop.eup %2719 }
 0x5c7   :  { %v2722_v11 = vpop.eup %2721 }
 0x5c8   :  { %v1862_v2 = vcombine.low %v2720_v9, %v2722_v11 }
 0x5ca   :  { %v1890_v53 = vrot.slane %v1862_v2, %v2902_v45 }
 0x5cc   :  { %v1892_v48 = vcombine.low %v1883_v26, %v1890_v53 }
 0x5ce   :  { %v1906_v18 = vrot.slane %v1892_v48, %v2902_v45 }
 0x5d0   :  { %v1907_v20 = vcombine.low %v1899_v14, %v1906_v18 }
 0x5d2   :  { %v1909_v29 = vmul.f32 %v1907_v20, %v1697_v19 }
 0x5d4   :  { %v1914_v41 = vrot.slane %v1909_v29, %v2907_v51  ;;  %v1918_v30 = vrot.slane %v1909_v29, %v2910_v52  ;;  %v1922_v32 = vrot.slane %v1909_v29, %v2952_v15  ;;  %v1926_v6 = vrot.slane %v1909_v29, %v2955_v16 }
 0x5d5   :  { %v1930_v33 = vrot.slane %v1909_v29, %v1929_v21  ;;  %v1934_v7 = vrot.slane %v1909_v29, %v1933_v22  ;;  %v1938_v36 = vrot.slane %v1909_v29, %v1937_v24  ;;  %v1942_v10 = vrot.slane %v1909_v29, %v1941_v25 }
 0x5d6   :  { %v1951_v63 = vmul.f32 %v1914_v41, %v3020_v59  ;;  %v1952_v40 = vmul.f32 %v1918_v30, %v3022_v62  ;;  %v1953_v44 = vmul.f32 %v1922_v32, %v3059_v35  ;;  %v1954_v43 = vmul.f32 %v1926_v6, %v3063_v50 }
 0x5d7   :  { %v1955_v23 = vmul.f32 %v1930_v33, %v3061_v37  ;;  %v1956_v39 = vmul.f32 %v1934_v7, %v3065_v38  ;;  %v1957_v42 = vmul.f32 %v1938_v36, %v1753_v55  ;;  %v1958_v47 = vmul.f32 %v1942_v10, %v1754_v57 }
 0x5d8   :  { %v1967_v49 = vcombine.low %v1951_v63, %v1952_v40  ;;  %v1968_v54 = vcombine.low %v1953_v44, %v1954_v43  ;;  %v2018_v56 = vmul.f32 %v1914_v41, %v3008_v12  ;;  %v2019_v58 = vmul.f32 %v1918_v30, %v3010_v17 }
 0x5d9   :  { %v1969_v60 = vcombine.low %v1955_v23, %v1956_v39  ;;  %v1970_v59 = vcombine.low %v1957_v42, %v1958_v47  ;;  %v2020_v62 = vmul.f32 %v1922_v32, %v3035_v27  ;;  %v2021_v35 = vmul.f32 %v1926_v6, %v3042_v31 }
 0x5da   :  { %v1977_v50 = vrot.slane %v1967_v49, %v2902_v45  ;;  %v1984_v37 = vrot.slane %v1968_v54, %v2902_v45  ;;  %v2022_v38 = vmul.f32 %v1930_v33, %v3037_v28  ;;  %v2023_v55 = vmul.f32 %v1934_v7, %v3047_v34 }
 0x5db   :  { %v1991_v57 = vrot.slane %v1969_v60, %v2902_v45  ;;  %v1998_v12 = vrot.slane %v1970_v59, %v2902_v45  ;;  %v2024_v17 = vmul.f32 %v1938_v36, %v3080_v46  ;;  %v2025_v61 = vmul.f32 %v1942_v10, %v3085_v13 }
 0x5dc   :  { %v1999_v0 = vcombine.low %v1977_v50, %v1984_v37 }
 0x5dd   :  { %v2000_v27 = vcombine.low %v1991_v57, %v1998_v12 }
 0x5de   :  { %v2007_v31 = vrot.slane %v1999_v0, %v2902_v45 }
 0x5df   :  { %v2014_v1 = vrot.slane %v2000_v27, %v2902_v45 }
 0x5e1   :  { %v2015_v4 = vcombine.low %v2007_v31, %v2014_v1 }
 0x5e3   :  { %v2017_v5 = vsub.f32 %v1698_v3, %v2015_v4 }
 0x5e5   :  { %v2030_v28 = vrot.slane %v2017_v5, %v2907_v51  ;;  %v2034_v34 = vrot.slane %v2017_v5, %v2910_v52  ;;  %v2038_v8 = vrot.slane %v2017_v5, %v2952_v15  ;;  %v2042_v9 = vrot.slane %v2017_v5, %v2955_v16 }
 0x5e6   :  { %v2046_v46 = vrot.slane %v2017_v5, %v1929_v21  ;;  %v2050_v11 = vrot.slane %v2017_v5, %v1933_v22  ;;  %v2054_v13 = vrot.slane %v2017_v5, %v1937_v24  ;;  %v2058_v2 = vrot.slane %v2017_v5, %v1941_v25 }
 0x5e7   :  { %v3128_v26 = vadd.f32 %v2030_v28, %v2018_v56  ;;  %v2068_v53 = vadd.f32 %v2034_v34, %v2019_v58  ;;  %v3130_v48 = vadd.f32 %v2038_v8, %v2020_v62  ;;  %v3132_v45 = vadd.f32 %v2042_v9, %v2021_v35 }
 0x5e8   :  { %v3134_v14 = vadd.f32 %v2046_v46, %v2022_v38  ;;  %v3136_v18 = vadd.f32 %v2050_v11, %v2023_v55  ;;  %v3138_v19 = vadd.f32 %v2054_v13, %v2024_v17  ;;  %v3140_v15 = vadd.f32 %v2058_v2, %v2025_v61 }
 0x5e9   :  { %v2075_v16 = vmax.f32 %v3128_v26, 0.0  ;;  %v2076_v20 = vmax.f32 %v2068_v53, 0.0  ;;  %v2077_v21 = vmax.f32 %v3130_v48, 0.0  ;;  %v2078_v22 = vmax.f32 %v3132_v45, 0.0 }
 0x5ea   :  { %v2079_v24 = vmax.f32 %v3134_v14, 0.0  ;;  %v2080_v25 = vmax.f32 %v3136_v18, 0.0  ;;  %v2081_v29 = vmax.f32 %v3138_v19, 0.0  ;;  %v2082_v41 = vmax.f32 %v3140_v15, 0.0 }
 0x5eb   :  { %2799 = dma.done.wait [#allocation4 + $0x1], 16384 }
 0x5ec   :  { %2800 = vsyncadd [#allocation4 + $0x1], 4294950912  ;;  %v2216_v30 = vpack.c.bf16 %v2076_v20, %v2076_v20  ;;  %v2088_v32 = vld [vmem:[#allocation3 + $0x8] sm:$0xff]  ;;  %v2087_v6 = vld [vmem:[#allocation3] sm:$0xff]  ;;  %v2215_v1 = vpack.c.bf16 %v2075_v16, %v2075_v16  ;;  %v2218_v3 = vpack.c.bf16 %v2078_v22, %v2078_v22 }
 0x5ed   :  { %v2090_v33 = vld [vmem:[#allocation3 + $0x18] sm:$0xff]  ;;  %2235 = vmatprep.subr.bf16.mxu0 %v2088_v32  ;;  %v2089_v7 = vld [vmem:[#allocation3 + $0x10] sm:$0xff]  ;;  %v2092_v36 = vld [vmem:[#allocation3 + $0x28] sm:$0xff] }
 0x5ee   :  { %2267 = vmatprep.mubr.bf16.mxu0 %v2216_v30  ;;  %2236 = vmatpush1.bf16.msra.mxu0 %v2087_v6  ;;  %v2091_v10 = vld [vmem:[#allocation3 + $0x20] sm:$0xff]  ;;  %v2094_v63 = vld [vmem:[#allocation3 + $0x38] sm:$0xff]  ;;  %v2093_v40 = vld [vmem:[#allocation3 + $0x30] sm:$0xff] }
 0x5ef   :  { %2237 = vmatprep.subr.bf16.mxu0 %v2090_v33  ;;  %v2096_v44 = vld [vmem:[#allocation3 + $0x48] sm:$0xff]  ;;  %v2095_v43 = vld [vmem:[#allocation3 + $0x40] sm:$0xff]  ;;  %v2098_v23 = vld [vmem:[#allocation3 + $0x58] sm:$0xff] }
 0x5f0   :  { %v2097_v39 = vld [vmem:[#allocation3 + $0x50] sm:$0xff]  ;;  %v2100_v42 = vld [vmem:[#allocation3 + $0x68] sm:$0xff]  ;;  %v2099_v47 = vld [vmem:[#allocation3 + $0x60] sm:$0xff] }
 0x5f1   :  { %v2102_v49 = vld [vmem:[#allocation3 + $0x78] sm:$0xff]  ;;  %v2101_v54 = vld [vmem:[#allocation3 + $0x70] sm:$0xff]  ;;  %v2104_v56 = vld [vmem:[#allocation3 + $0x88] sm:$0xff] }
 0x5f2   :  { %2238 = vmatpush1.bf16.msra.mxu0 %v2089_v7  ;;  %v2103_v58 = vld [vmem:[#allocation3 + $0x80] sm:$0xff]  ;;  %v2106_v60 = vld [vmem:[#allocation3 + $0x98] sm:$0xff]  ;;  %v2105_v59 = vld [vmem:[#allocation3 + $0x90] sm:$0xff] }
 0x5f3   :  { %2239 = vmatprep.subr.bf16.mxu0 %v2092_v36  ;;  %v2108_v62 = vld [vmem:[#allocation3 + $0xa8] sm:$0xff]  ;;  %v2107_v35 = vld [vmem:[#allocation3 + $0xa0] sm:$0xff]  ;;  %v2110_v50 = vld [vmem:[#allocation3 + $0xb8] sm:$0xff] }
 0x5f4   :  { %v2109_v37 = vld [vmem:[#allocation3 + $0xb0] sm:$0xff]  ;;  %v2112_v38 = vld [vmem:[#allocation3 + $0xc8] sm:$0xff]  ;;  %v2111_v55 = vld [vmem:[#allocation3 + $0xc0] sm:$0xff] }
 0x5f5   :  { %v2114_v57 = vld [vmem:[#allocation3 + $0xd8] sm:$0xff]  ;;  %v2113_v12 = vld [vmem:[#allocation3 + $0xd0] sm:$0xff]  ;;  %v2116_v17 = vld [vmem:[#allocation3 + $0xe8] sm:$0xff] }
 0x5f6   :  { %2240 = vmatpush1.bf16.msra.mxu0 %v2091_v10  ;;  %v2115_v61 = vld [vmem:[#allocation3 + $0xe0] sm:$0xff]  ;;  %v2118_v0 = vld [vmem:[#allocation3 + $0xf8] sm:$0xff]  ;;  %v2117_v27 = vld [vmem:[#allocation3 + $0xf0] sm:$0xff] }
 0x5f7   :  { %2241 = vmatprep.subr.bf16.mxu0 %v2094_v63  ;;  %v2120_v31 = vld [vmem:[#allocation3 + $0x108] sm:$0xff]  ;;  %v2119_v4 = vld [vmem:[#allocation3 + $0x100] sm:$0xff]  ;;  %v2122_v5 = vld [vmem:[#allocation3 + $0x118] sm:$0xff] }
 0x5f8   :  { %v2121_v28 = vld [vmem:[#allocation3 + $0x110] sm:$0xff]  ;;  %v2124_v34 = vld [vmem:[#allocation3 + $0x128] sm:$0xff]  ;;  %v2123_v8 = vld [vmem:[#allocation3 + $0x120] sm:$0xff] }
 0x5f9   :  { %v2126_v9 = vld [vmem:[#allocation3 + $0x138] sm:$0xff]  ;;  %v2125_v46 = vld [vmem:[#allocation3 + $0x130] sm:$0xff]  ;;  %v2128_v11 = vld [vmem:[#allocation3 + $0x148] sm:$0xff] }
 0x5fa   :  { %2242 = vmatpush1.bf16.msra.mxu0 %v2093_v40  ;;  %v2127_v13 = vld [vmem:[#allocation3 + $0x140] sm:$0xff]  ;;  %v2130_v2 = vld [vmem:[#allocation3 + $0x158] sm:$0xff]  ;;  %v2129_v26 = vld [vmem:[#allocation3 + $0x150] sm:$0xff] }
 0x5fb   :  { %2243 = vmatprep.subr.bf16.mxu0 %v2096_v44  ;;  %v2132_v53 = vld [vmem:[#allocation3 + $0x168] sm:$0xff]  ;;  %v2131_v45 = vld [vmem:[#allocation3 + $0x160] sm:$0xff]  ;;  %v2134_v16 = vld [vmem:[#allocation3 + $0x178] sm:$0xff] }
 0x5fc   :  { %v2133_v20 = vld [vmem:[#allocation3 + $0x170] sm:$0xff]  ;;  %v2136_v22 = vld [vmem:[#allocation3 + $0x188] sm:$0xff]  ;;  %v2135_v30 = vld [vmem:[#allocation3 + $0x180] sm:$0xff] }
 0x5fd   :  { %v2138_v32 = vld [vmem:[#allocation3 + $0x198] sm:$0xff]  ;;  %v2137_v6 = vld [vmem:[#allocation3 + $0x190] sm:$0xff]  ;;  %v2140_v33 = vld [vmem:[#allocation3 + $0x1a8] sm:$0xff] }
 0x5fe   :  { %2244 = vmatpush1.bf16.msra.mxu0 %v2095_v43  ;;  %v2139_v7 = vld [vmem:[#allocation3 + $0x1a0] sm:$0xff]  ;;  %v2142_v36 = vld [vmem:[#allocation3 + $0x1b8] sm:$0xff]  ;;  %v2141_v10 = vld [vmem:[#allocation3 + $0x1b0] sm:$0xff] }
 0x5ff   :  { %2245 = vmatprep.subr.bf16.mxu0 %v2098_v23  ;;  %v2144_v63 = vld [vmem:[#allocation3 + $0x1c8] sm:$0xff]  ;;  %v2143_v40 = vld [vmem:[#allocation3 + $0x1c0] sm:$0xff]  ;;  %v2146_v44 = vld [vmem:[#allocation3 + $0x1d8] sm:$0xff] }
 0x600   :  { %v2145_v43 = vld [vmem:[#allocation3 + $0x1d0] sm:$0xff]  ;;  %v2148_v23 = vld [vmem:[#allocation3 + $0x1e8] sm:$0xff]  ;;  %v2158_v48 = vld [vmem:[#allocation3 + $0x238] sm:$0xff] }
 0x601   :  { %v2159_v18 = vld [vmem:[#allocation3 + $0x240] sm:$0xff]  ;;  %v2190_v14 = vld [vmem:[#allocation3 + $0x338] sm:$0xff] }
 0x602   :  { %2246 = vmatpush1.bf16.msra.mxu0 %v2097_v39  ;;  %v2147_v39 = vld [vmem:[#allocation3 + $0x1e0] sm:$0xff] }
 0x603   :  { %2247 = vmatprep.subr.bf16.mxu0 %v2100_v42  ;;  %v2150_v42 = vld [vmem:[#allocation3 + $0x1f8] sm:$0xff]  ;;  %v2191_v15 = vld [vmem:[#allocation3 + $0x340] sm:$0xff] }
 0x606   :  { %2248 = vmatpush1.bf16.msra.mxu0 %v2099_v47  ;;  %v2149_v47 = vld [vmem:[#allocation3 + $0x1f0] sm:$0xff] }
 0x607   :  { %2249 = vmatprep.subr.bf16.mxu0 %v2102_v49  ;;  %v2152_v49 = vld [vmem:[#allocation3 + $0x208] sm:$0xff] }
 0x60a   :  { %2250 = vmatpush1.bf16.msra.mxu0 %v2101_v54  ;;  %v2217_v54 = vpack.c.bf16 %v2077_v21, %v2077_v21  ;;  %v2157_v21 = vld [vmem:[#allocation3 + $0x230] sm:$0xff] }
 0x60b   :  { %2251 = vmatprep.subr.bf16.mxu0 %v2104_v56  ;;  %v2220_v56 = vpack.c.bf16 %v2080_v25, %v2080_v25  ;;  %v2162_v25 = vld [vmem:[#allocation3 + $0x258] sm:$0xff] }
 0x60e   :  { %2252 = vmatpush1.bf16.msra.mxu0 %v2103_v58  ;;  %v2151_v58 = vld [vmem:[#allocation3 + $0x200] sm:$0xff] }
 0x60f   :  { %2253 = vmatprep.subr.bf16.mxu0 %v2106_v60  ;;  %v2154_v60 = vld [vmem:[#allocation3 + $0x218] sm:$0xff] }
 0x612   :  { %2254 = vmatpush1.bf16.msra.mxu0 %v2105_v59  ;;  %v2153_v59 = vld [vmem:[#allocation3 + $0x210] sm:$0xff] }
 0x613   :  { %2255 = vmatprep.subr.bf16.mxu0 %v2108_v62  ;;  %v2156_v62 = vld [vmem:[#allocation3 + $0x228] sm:$0xff] }
 0x616   :  { %2256 = vmatpush1.bf16.msra.mxu0 %v2107_v35  ;;  %v2155_v35 = vld [vmem:[#allocation3 + $0x220] sm:$0xff] }
 0x617   :  { %2257 = vmatprep.subr.bf16.mxu0 %v2110_v50  ;;  %v2160_v50 = vld [vmem:[#allocation3 + $0x248] sm:$0xff] }
 0x61a   :  { %2258 = vmatpush1.bf16.msra.mxu0 %v2109_v37  ;;  %v2161_v37 = vld [vmem:[#allocation3 + $0x250] sm:$0xff] }
 0x61b   :  { %2259 = vmatprep.subr.bf16.mxu0 %v2112_v38  ;;  %v2164_v38 = vld [vmem:[#allocation3 + $0x268] sm:$0xff] }
 0x61e   :  { %2260 = vmatpush1.bf16.msra.mxu0 %v2111_v55  ;;  %v2163_v55 = vld [vmem:[#allocation3 + $0x260] sm:$0xff] }
 0x61f   :  { %2261 = vmatprep.subr.bf16.mxu0 %v2114_v57  ;;  %v2166_v57 = vld [vmem:[#allocation3 + $0x278] sm:$0xff] }
 0x622   :  { %2262 = vmatpush1.bf16.msra.mxu0 %v2113_v12  ;;  %v2165_v12 = vld [vmem:[#allocation3 + $0x270] sm:$0xff] }
 0x623   :  { %2263 = vmatprep.subr.bf16.mxu0 %v2116_v17  ;;  %v2168_v17 = vld [vmem:[#allocation3 + $0x288] sm:$0xff] }
 0x626   :  { %2264 = vmatpush1.bf16.msra.mxu0 %v2115_v61  ;;  %v2167_v61 = vld [vmem:[#allocation3 + $0x280] sm:$0xff] }
 0x627   :  { %2265 = vmatprep.subr.bf16.mxu0 %v2118_v0  ;;  %v2170_v0 = vld [vmem:[#allocation3 + $0x298] sm:$0xff] }
 0x62a   :  { %2266 = vmatpush1.bf16.msra.mxu0 %v2117_v27  ;;  %v2169_v27 = vld [vmem:[#allocation3 + $0x290] sm:$0xff] }
 0x62b   :  { %2276 = vmatprep.subr.bf16.mxu0 %v2120_v31  ;;  %v2172_v31 = vld [vmem:[#allocation3 + $0x2a8] sm:$0xff] }
 0x62d   :  { %2268 = vmatmul.mubr.bf16.vlgmr.msra.gmra.mrb[12].mxu0 %v2215_v1  ;;  %v2171_v1 = vld [vmem:[#allocation3 + $0x2a0] sm:$0xff] }
 0x62e   :  { %2277 = vmatpush1.bf16.msra.mxu0 %v2119_v4  ;;  %2308 = vmatprep.mubr.bf16.mxu0 %v2218_v3  ;;  %v2174_v3 = vld [vmem:[#allocation3 + $0x2b8] sm:$0xff]  ;;  %v2173_v4 = vld [vmem:[#allocation3 + $0x2b0] sm:$0xff] }
 0x62f   :  { %2278 = vmatprep.subr.bf16.mxu0 %v2122_v5  ;;  %v2176_v5 = vld [vmem:[#allocation3 + $0x2c8] sm:$0xff] }
 0x632   :  { %2279 = vmatpush1.bf16.msra.mxu0 %v2121_v28  ;;  %v2175_v28 = vld [vmem:[#allocation3 + $0x2c0] sm:$0xff] }
 0x633   :  { %2280 = vmatprep.subr.bf16.mxu0 %v2124_v34  ;;  %v2178_v34 = vld [vmem:[#allocation3 + $0x2d8] sm:$0xff] }
 0x636   :  { %2281 = vmatpush1.bf16.msra.mxu0 %v2123_v8  ;;  %v2177_v8 = vld [vmem:[#allocation3 + $0x2d0] sm:$0xff] }
 0x637   :  { %2282 = vmatprep.subr.bf16.mxu0 %v2126_v9  ;;  %v2180_v9 = vld [vmem:[#allocation3 + $0x2e8] sm:$0xff] }
 0x63a   :  { %2283 = vmatpush1.bf16.msra.mxu0 %v2125_v46  ;;  %v2179_v46 = vld [vmem:[#allocation3 + $0x2e0] sm:$0xff] }
 0x63b   :  { %2284 = vmatprep.subr.bf16.mxu0 %v2128_v11  ;;  %v2182_v11 = vld [vmem:[#allocation3 + $0x2f8] sm:$0xff] }
 0x63e   :  { %2285 = vmatpush1.bf16.msra.mxu0 %v2127_v13  ;;  %v2181_v13 = vld [vmem:[#allocation3 + $0x2f0] sm:$0xff] }
 0x63f   :  { %2286 = vmatprep.subr.bf16.mxu0 %v2130_v2  ;;  %v2184_v2 = vld [vmem:[#allocation3 + $0x308] sm:$0xff] }
 0x642   :  { %2287 = vmatpush1.bf16.msra.mxu0 %v2129_v26  ;;  %v2219_v26 = vpack.c.bf16 %v2079_v24, %v2079_v24  ;;  %v2189_v24 = vld [vmem:[#allocation3 + $0x330] sm:$0xff] }
 0x643   :  { %2288 = vmatprep.subr.bf16.mxu0 %v2132_v53  ;;  %v2222_v53 = vpack.c.bf16 %v2082_v41, %v2082_v41  ;;  %v2194_v41 = vld [vmem:[#allocation3 + $0x358] sm:$0xff] }
 0x646   :  { %2289 = vmatpush1.bf16.msra.mxu0 %v2131_v45  ;;  %v2183_v45 = vld [vmem:[#allocation3 + $0x300] sm:$0xff] }
 0x647   :  { %2290 = vmatprep.subr.bf16.mxu0 %v2134_v16  ;;  %v2186_v16 = vld [vmem:[#allocation3 + $0x318] sm:$0xff] }
 0x64a   :  { %2291 = vmatpush1.bf16.msra.mxu0 %v2133_v20  ;;  %v2185_v20 = vld [vmem:[#allocation3 + $0x310] sm:$0xff] }
 0x64b   :  { %2292 = vmatprep.subr.bf16.mxu0 %v2136_v22  ;;  %v2188_v22 = vld [vmem:[#allocation3 + $0x328] sm:$0xff] }
 0x64e   :  { %2293 = vmatpush1.bf16.msra.mxu0 %v2135_v30  ;;  %v2187_v30 = vld [vmem:[#allocation3 + $0x320] sm:$0xff] }
 0x64f   :  { %2294 = vmatprep.subr.bf16.mxu0 %v2138_v32  ;;  %v2192_v32 = vld [vmem:[#allocation3 + $0x348] sm:$0xff] }
 0x652   :  { %2295 = vmatpush1.bf16.msra.mxu0 %v2137_v6  ;;  %v2193_v6 = vld [vmem:[#allocation3 + $0x350] sm:$0xff] }
 0x653   :  { %2296 = vmatprep.subr.bf16.mxu0 %v2140_v33  ;;  %v2196_v33 = vld [vmem:[#allocation3 + $0x368] sm:$0xff] }
 0x656   :  { %2297 = vmatpush1.bf16.msra.mxu0 %v2139_v7  ;;  %v2195_v7 = vld [vmem:[#allocation3 + $0x360] sm:$0xff] }
 0x657   :  { %2298 = vmatprep.subr.bf16.mxu0 %v2142_v36  ;;  %v2198_v36 = vld [vmem:[#allocation3 + $0x378] sm:$0xff] }
 0x65a   :  { %2299 = vmatpush1.bf16.msra.mxu0 %v2141_v10  ;;  %v2197_v10 = vld [vmem:[#allocation3 + $0x370] sm:$0xff] }
 0x65b   :  { %2300 = vmatprep.subr.bf16.mxu0 %v2144_v63  ;;  %v2200_v63 = vld [vmem:[#allocation3 + $0x388] sm:$0xff] }
 0x65e   :  { %2301 = vmatpush1.bf16.msra.mxu0 %v2143_v40  ;;  %v2199_v40 = vld [vmem:[#allocation3 + $0x380] sm:$0xff] }
 0x65f   :  { %2302 = vmatprep.subr.bf16.mxu0 %v2146_v44  ;;  %v2202_v44 = vld [vmem:[#allocation3 + $0x398] sm:$0xff] }
 0x662   :  { %2303 = vmatpush1.bf16.msra.mxu0 %v2145_v43  ;;  %v2201_v43 = vld [vmem:[#allocation3 + $0x390] sm:$0xff] }
 0x663   :  { %2304 = vmatprep.subr.bf16.mxu0 %v2148_v23  ;;  %v2204_v23 = vld [vmem:[#allocation3 + $0x3a8] sm:$0xff] }
 0x666   :  { %2305 = vmatpush1.bf16.msra.mxu0 %v2147_v39  ;;  %v2203_v39 = vld [vmem:[#allocation3 + $0x3a0] sm:$0xff] }
 0x667   :  { %2306 = vmatprep.subr.bf16.mxu0 %v2150_v42  ;;  %v2206_v42 = vld [vmem:[#allocation3 + $0x3b8] sm:$0xff] }
 0x66a   :  { %2307 = vmatpush1.bf16.msra.mxu0 %v2149_v47  ;;  %v2205_v47 = vld [vmem:[#allocation3 + $0x3b0] sm:$0xff] }
 0x66b   :  { %2317 = vmatprep.subr.bf16.mxu0 %v2152_v49  ;;  %v2208_v49 = vld [vmem:[#allocation3 + $0x3c8] sm:$0xff] }
 0x66d   :  { %2309 = vmatmul.mubr.bf16.vlgmr.msra.gmra.mrb[12].mxu0 %v2217_v54  ;;  %v2207_v54 = vld [vmem:[#allocation3 + $0x3c0] sm:$0xff] }
 0x66e   :  { %2318 = vmatpush1.bf16.msra.mxu0 %v2151_v58  ;;  %2349 = vmatprep.mubr.bf16.mxu0 %v2220_v56  ;;  %v2210_v56 = vld [vmem:[#allocation3 + $0x3d8] sm:$0xff]  ;;  %v2209_v58 = vld [vmem:[#allocation3 + $0x3d0] sm:$0xff] }
 0x66f   :  { %2319 = vmatprep.subr.bf16.mxu0 %v2154_v60  ;;  %v2212_v60 = vld [vmem:[#allocation3 + $0x3e8] sm:$0xff] }
 0x672   :  { %2320 = vmatpush1.bf16.msra.mxu0 %v2153_v59  ;;  %v2211_v59 = vld [vmem:[#allocation3 + $0x3e0] sm:$0xff] }
 0x673   :  { %2321 = vmatprep.subr.bf16.mxu0 %v2156_v62  ;;  %v2214_v62 = vld [vmem:[#allocation3 + $0x3f8] sm:$0xff] }
 0x676   :  { %2322 = vmatpush1.bf16.msra.mxu0 %v2155_v35  ;;  %v2213_v35 = vld [vmem:[#allocation3 + $0x3f0] sm:$0xff] }
 0x677   :  { %2323 = vmatprep.subr.bf16.mxu0 %v2158_v48  ;;  %v2221_v48 = vpack.c.bf16 %v2081_v29, %v2081_v29 }
 0x67a   :  { %2324 = vmatpush1.bf16.msra.mxu0 %v2157_v21  ;;  %v2223_v21 = vld [vmem:[#allocation9 + $0x1] sm:$0x3] }
 0x67b   :  { %2325 = vmatprep.subr.bf16.mxu0 %v2160_v50  ;;  %v2228_v50 = vrot.slane %v2223_v21, %v2907_v51 }
 0x67e   :  { %2326 = vmatpush1.bf16.msra.mxu0 %v2159_v18  ;;  %v2232_v18 = vrot.slane %v2223_v21, %v2910_v52 }
 0x67f   :  { %2327 = vmatprep.subr.bf16.mxu0 %v2162_v25 }
 0x682   :  { %2328 = vmatpush1.bf16.msra.mxu0 %v2161_v37 }
 0x683   :  { %2329 = vmatprep.subr.bf16.mxu0 %v2164_v38 }
 0x686   :  { %2330 = vmatpush1.bf16.msra.mxu0 %v2163_v55 }
 0x687   :  { %2331 = vmatprep.subr.bf16.mxu0 %v2166_v57 }
 0x68a   :  { %2332 = vmatpush1.bf16.msra.mxu0 %v2165_v12 }
 0x68b   :  { %2333 = vmatprep.subr.bf16.mxu0 %v2168_v17 }
 0x68e   :  { %2334 = vmatpush1.bf16.msra.mxu0 %v2167_v61 }
 0x68f   :  { %2335 = vmatprep.subr.bf16.mxu0 %v2170_v0 }
 0x692   :  { %2336 = vmatpush1.bf16.msra.mxu0 %v2169_v27 }
 0x693   :  { %2337 = vmatprep.subr.bf16.mxu0 %v2172_v31 }
 0x696   :  { %2338 = vmatpush1.bf16.msra.mxu0 %v2171_v1 }
 0x697   :  { %2339 = vmatprep.subr.bf16.mxu0 %v2174_v3 }
 0x69a   :  { %2340 = vmatpush1.bf16.msra.mxu0 %v2173_v4 }
 0x69b   :  { %2341 = vmatprep.subr.bf16.mxu0 %v2176_v5 }
 0x69e   :  { %2342 = vmatpush1.bf16.msra.mxu0 %v2175_v28 }
 0x69f   :  { %2343 = vmatprep.subr.bf16.mxu0 %v2178_v34 }
 0x6a2   :  { %2344 = vmatpush1.bf16.msra.mxu0 %v2177_v8 }
 0x6a3   :  { %2345 = vmatprep.subr.bf16.mxu0 %v2180_v9 }
 0x6a6   :  { %2346 = vmatpush1.bf16.msra.mxu0 %v2179_v46 }
 0x6a7   :  { %2347 = vmatprep.subr.bf16.mxu0 %v2182_v11 }
 0x6aa   :  { %2348 = vmatpush1.bf16.msra.mxu0 %v2181_v13 }
 0x6ab   :  { %2358 = vmatprep.subr.bf16.mxu0 %v2184_v2 }
 0x6ad   :  { %2350 = vmatmul.mubr.bf16.vlgmr.msra.gmra.mrb[12].mxu0 %v2219_v26 }
 0x6ae   :  { %2359 = vmatpush1.bf16.msra.mxu0 %v2183_v45  ;;  %2390 = vmatprep.mubr.bf16.mxu0 %v2222_v53 }
 0x6af   :  { %2360 = vmatprep.subr.bf16.mxu0 %v2186_v16 }
 0x6b2   :  { %2361 = vmatpush1.bf16.msra.mxu0 %v2185_v20 }
 0x6b3   :  { %2362 = vmatprep.subr.bf16.mxu0 %v2188_v22 }
 0x6b6   :  { %2363 = vmatpush1.bf16.msra.mxu0 %v2187_v30 }
 0x6b7   :  { %2364 = vmatprep.subr.bf16.mxu0 %v2190_v14 }
 0x6ba   :  { %2365 = vmatpush1.bf16.msra.mxu0 %v2189_v24 }
 0x6bb   :  { %2366 = vmatprep.subr.bf16.mxu0 %v2192_v32 }
 0x6be   :  { %2367 = vmatpush1.bf16.msra.mxu0 %v2191_v15 }
 0x6bf   :  { %2368 = vmatprep.subr.bf16.mxu0 %v2194_v41 }
 0x6c2   :  { %2369 = vmatpush1.bf16.msra.mxu0 %v2193_v6 }
 0x6c3   :  { %2370 = vmatprep.subr.bf16.mxu0 %v2196_v33 }
 0x6c6   :  { %2371 = vmatpush1.bf16.msra.mxu0 %v2195_v7 }
 0x6c7   :  { %2372 = vmatprep.subr.bf16.mxu0 %v2198_v36 }
 0x6ca   :  { %2373 = vmatpush1.bf16.msra.mxu0 %v2197_v10 }
 0x6cb   :  { %2374 = vmatprep.subr.bf16.mxu0 %v2200_v63 }
 0x6ce   :  { %2375 = vmatpush1.bf16.msra.mxu0 %v2199_v40 }
 0x6cf   :  { %2376 = vmatprep.subr.bf16.mxu0 %v2202_v44 }
 0x6d2   :  { %2377 = vmatpush1.bf16.msra.mxu0 %v2201_v43 }
 0x6d3   :  { %2378 = vmatprep.subr.bf16.mxu0 %v2204_v23 }
 0x6d6   :  { %2379 = vmatpush1.bf16.msra.mxu0 %v2203_v39 }
 0x6d7   :  { %2380 = vmatprep.subr.bf16.mxu0 %v2206_v42 }
 0x6da   :  { %2381 = vmatpush1.bf16.msra.mxu0 %v2205_v47 }
 0x6db   :  { %2382 = vmatprep.subr.bf16.mxu0 %v2208_v49 }
 0x6de   :  { %2383 = vmatpush1.bf16.msra.mxu0 %v2207_v54 }
 0x6df   :  { %2384 = vmatprep.subr.bf16.mxu0 %v2210_v56 }
 0x6e2   :  { %2385 = vmatpush1.bf16.msra.mxu0 %v2209_v58 }
 0x6e3   :  { %2386 = vmatprep.subr.bf16.mxu0 %v2212_v60 }
 0x6e6   :  { %2387 = vmatpush1.bf16.msra.mxu0 %v2211_v59 }
 0x6e7   :  { %2388 = vmatprep.subr.bf16.mxu0 %v2214_v62 }
 0x6ea   :  { %2389 = vmatpush1.bf16.msra.mxu0 %v2213_v35 }
 0x6ed   :  { %2391 = vmatmul.mubr.bf16.vlgmr.msra.gmra.mrb[12].mxu0 %v2221_v48 }
 0x7c0   :  { %v2392_v25 = vpop.f32.mrb[12].mxu0 }
 0x7c1   :  { %v2525_v37 = vadd.f32 %v2392_v25, %v2228_v50  ;;  %v2394_v38 = vpop.f32.mrb[13].mxu0 }
 0x7c2   :  { %v2526_v55 = vadd.f32 %v2394_v38, %v2232_v18  ;;  %v2396_v57 = vpop.f32.mrb[14].mxu0 }
 0x7c3   :  { %2723 = vtanh.f32 %v2525_v37  ;;  %v2397_v12 = vpop.f32.mrb[15].mxu0 }
 0x7c4   :  { %2725 = vtanh.f32 %v2526_v55 }
 0x7cd   :  { %v2724_v17 = vpop.eup %2723 }
 0x7ce   :  { %v2726_v61 = vpop.eup %2725  ;;  %2401 = vst [vmem:[%s3183_s5] sm:$0xff] %v2724_v17 }
 0x7cf   :  { %2402 = vst [vmem:[%s3183_s5 + $0x8] sm:$0xff] %v2726_v61 }
 0x7d0   :  { %2407 = vsyncpa [#allocation6], 1 }
 0x7d1   :  { %2408 = vsyncpa [#allocation8], 1 }
 0x7d2   :  { %2409 = vsyncmov [#allocation4] }
 0x7d5   :  { %s2410_s27 = vpop.sfrf %2409 }
 0x7d6   :  { %p2510_p10 = scmp.ne.s32.totalorder %s2410_s27, 0 }
 0x7d8   :  { %2414 = shalt.err (%p2510_p10)  }
 0x7d9   :  { %2416 = vsyncmov [#allocation4 + $0x1] }
 0x7dc   :  { %s2417_s29 = vpop.sfrf %2416 }
 0x7dd   :  { %p2511_p11 = scmp.ne.s32.totalorder %s2417_s29, 0 }
 0x7df   :  { %2421 = shalt.err (%p2511_p11)  }

</bundles_post_ra>
